<compile_context>
chip_gen: v5e
topology: v5e:2x2
jax: 0.10.0
libtpu: 0.0.40
codegen_flags: <defaults>
</compile_context>

<pallas_src>
import jax
import jax.numpy as jnp
import numpy as np
from jax.experimental import pallas as pl
from jax.experimental.pallas import tpu as pltpu

# ---------------- static config (small, consistent with the module) ----------
IMAGE_H = IMAGE_W = 16
PATCH_H = PATCH_W = 4
CHANNELS = 4
DEPTH = 2
HEADS = 2
DIM = 32
DIM_HEAD = 16
MLP_DIM = 64
NUM_CLASSES = 8
NC2 = NUM_CLASSES // 2              # int(num_classes / 2)
POOL = "cls"

NUM_PATCHES = (IMAGE_H // PATCH_H) * (IMAGE_W // PATCH_W)    # 16
PATCH_DIM = CHANNELS * PATCH_H * PATCH_W                     # 64
INNER = HEADS * DIM_HEAD                                     # 32
SEQ = NUM_PATCHES + 1                                        # 17
SCALE = DIM_HEAD ** (-0.5)
LN_EPS = 1e-5
BN_EPS = 1e-5
PACK_LANES = 3 * INNER                                       # 96: widest packed slab (fused wqkv)
OUT_LANES = 128                                              # lane-dense output width


# ---------------- packed-parameter layout (static, shared by packer+kernel) --
def _build_layout():
    layout = {}
    row = 0

    def add(name, shape, align=8):
        nonlocal row
        row = -(-row // align) * align          # MXU weights start sublane-aligned
        layout[name] = (row, shape)
        row += shape[0]

    add("wp", (PATCH_DIM, DIM))                 # patch embedding weight
    add("B", (SEQ, DIM))                        # pos + [cls ; bp] fused additive term
    for d in range(DEPTH):
        add(f"wqkv_{d}", (DIM, 3 * INNER))      # fused QKV (scale folded into Q cols)
        add(f"wo_{d}", (INNER, DIM))            # attention output projection
        add(f"w1_{d}", (DIM, MLP_DIM))
        add(f"w2_{d}", (MLP_DIM, DIM))
        # 1-row vectors packed densely (no 8-row padding)
        add(f"ln1w_{d}", (1, DIM), align=1)
        add(f"ln1b_{d}", (1, DIM), align=1)
        add(f"bo_{d}", (1, DIM), align=1)
        add(f"ln2w_{d}", (1, DIM), align=1)
        add(f"ln2b_{d}", (1, DIM), align=1)
        add(f"b2_{d}", (1, DIM), align=1)
        add(f"b1_{d}", (1, MLP_DIM), align=1)
    add("lnfw", (1, DIM), align=1)
    add("lnfb", (1, DIM), align=1)
    add("c1w", (NC2, 1), align=1)               # conv1 weight column (BN scale folded)
    add("bn1h", (NC2, 1), align=1)
    add("bn2h", (NUM_CLASSES, 1), align=1)
    add("c2w", (NUM_CLASSES, NC2))              # conv2 weight (BN scale folded)
    total = -(-row // 8) * 8
    return layout, total


LAYOUT, TOTAL_ROWS = _build_layout()


# ---------------- kernel-side math helpers ------------------------------------
def _layernorm_1p(x, w, b):
    # single-pass LN: var = E[x^2] - mu^2 (two independent reductions)
    mu = jnp.mean(x, axis=-1, keepdims=True)
    m2 = jnp.mean(x * x, axis=-1, keepdims=True)
    var = m2 - mu * mu
    return (x - mu) * jax.lax.rsqrt(var + LN_EPS) * w + b


def _gelu_tanh(x):
    # tanh-approximation GELU (single EUP tanh); error << test tolerance
    return 0.5 * x * (1.0 + jnp.tanh(0.7978845608028654 * (x + 0.044715 * x * x * x)))


def _softmax(x):
    m = jnp.max(x, axis=-1, keepdims=True)
    e = jnp.exp(x - m)
    return e / jnp.sum(e, axis=-1, keepdims=True)


# ---------------- the fused ViT forward kernel -------------------------------
def vit_kernel(patches_ref, p_ref, out_ref):
    f32 = jnp.float32

    def par(name):
        r, (nr, nc) = LAYOUT[name]
        return p_ref[r:r + nr, 0:nc]            # static slice of the packed buffer

    # patch embedding with fused bias: row 0 of `patches` is zero, so
    # x[0] = B[0] = cls + pos[0]; rows 1.. = patches @ wp + bp + pos[1..]
    x = jnp.dot(patches_ref[...], par("wp"), preferred_element_type=f32) + par("B")

    for d in range(DEPTH):
        last = (d == DEPTH - 1)   # final block: only the cls row is consumed downstream

        # ---- PreNorm + multi-head self-attention + residual ----
        h = _layernorm_1p(x, par(f"ln1w_{d}"), par(f"ln1b_{d}"))
        # ONE fused QKV matmul; attention scale pre-folded into the Q columns.
        qkv = jnp.dot(h, par(f"wqkv_{d}"), preferred_element_type=f32)   # (rows, 96)
        q_src = qkv[0:1, :] if last else qkv                             # cls-only Q in last block
        heads_out = []
        for hh in range(HEADS):
            q_h = q_src[:, hh * DIM_HEAD:(hh + 1) * DIM_HEAD]
            k_h = qkv[:, INNER + hh * DIM_HEAD:INNER + (hh + 1) * DIM_HEAD]
            v_h = qkv[:, 2 * INNER + hh * DIM_HEAD:2 * INNER + (hh + 1) * DIM_HEAD]
            dots = jax.lax.dot_general(q_h, k_h, (((1,), (1,)), ((), ())),
                                       preferred_element_type=f32)       # (rows_q, rows_kv)
            p_attn = _softmax(dots)
            heads_out.append(jnp.dot(p_attn, v_h, preferred_element_type=f32))
        o = jnp.concatenate(heads_out, axis=-1)                          # (rows_q, INNER)
        attn = jnp.dot(o, par(f"wo_{d}"), preferred_element_type=f32) + par(f"bo_{d}")
        x_res = x[0:1, :] if last else x
        x = attn + x_res

        # ---- PreNorm + FeedForward (Linear -> GELU -> Linear) + residual ----
        h = _layernorm_1p(x, par(f"ln2w_{d}"), par(f"ln2b_{d}"))
        h = _gelu_tanh(jnp.dot(h, par(f"w1_{d}"), preferred_element_type=f32) + par(f"b1_{d}"))
        h = jnp.dot(h, par(f"w2_{d}"), preferred_element_type=f32) + par(f"b2_{d}")
        x = h + x                                                        # (1, DIM) after last block

    # pool == 'cls' -> x is already the cls row; final LayerNorm
    cls = _layernorm_1p(x, par("lnfw"), par("lnfb"))                     # (1, DIM)

    # mlp_head on the (1, 1, DIM, 1) view: 1x1 convs are channel matmuls;
    # BatchNorm2d (running stats / inference) folded into the conv weights +
    # per-channel shift.  Conv1 has K=1 -> rank-1 outer product on the VPU.
    y = par("c1w") * cls                                                 # (NC2, DIM)
    y = jnp.maximum(y + par("bn1h"), 0.0)
    z = jnp.dot(par("c2w"), y, preferred_element_type=f32)               # (NUM_CLASSES, DIM)
    z = jnp.maximum(z + par("bn2h"), 0.0)
    # lane-dense (unmasked) store: pad to 128 lanes, wrapper slices [:, :DIM]
    out_ref[...] = jnp.concatenate(
        [z, jnp.zeros((NUM_CLASSES, OUT_LANES - DIM), f32)], axis=-1)


# ---------------- wrapper -----------------------------------------------------
def to_patches(img):
    # einops: 'b c (h p1) (w p2) -> b (h w) (p1 p2 c)'
    b, c, H, W = img.shape
    h, w = H // PATCH_H, W // PATCH_W
    x = img.reshape(b, c, h, PATCH_H, w, PATCH_W)
    x = x.transpose(0, 2, 4, 3, 5, 1)                 # b h w p1 p2 c
    return x.reshape(b, h * w, PATCH_H * PATCH_W * c)


def pack_params(p):
    """Dense-pack all parameters into one (TOTAL_ROWS, 96) f32 buffer (single DMA)."""
    buf = np.zeros((TOTAL_ROWS, PACK_LANES), np.float32)

    def put(name, arr):
        r, (nr, nc) = LAYOUT[name]
        buf[r:r + nr, :nc] = np.asarray(arr, np.float32).reshape(nr, nc)

    # fused additive term: B = pos + vstack(cls, broadcast(bp))
    B = np.asarray(p["pos"], np.float32) + np.vstack(
        [np.asarray(p["cls"], np.float32),
         np.broadcast_to(np.asarray(p["bp"], np.float32), (NUM_PATCHES, DIM))])
    put("wp", p["wp"])
    put("B", B)
    for d in range(DEPTH):
        wqkv = np.asarray(p["wqkv"][d], np.float32).copy()     # (DIM, 3*INNER)
        wqkv[:, :INNER] *= SCALE                               # fold attention scale into Q
        put(f"wqkv_{d}", wqkv)
        put(f"wo_{d}", p["wo"][d])
        put(f"w1_{d}", p["w1"][d])
        put(f"w2_{d}", p["w2"][d])
        put(f"ln1w_{d}", p["ln1w"][d]); put(f"ln1b_{d}", p["ln1b"][d])
        put(f"bo_{d}", p["bo"][d])
        put(f"ln2w_{d}", p["ln2w"][d]); put(f"ln2b_{d}", p["ln2b"][d])
        put(f"b2_{d}", p["b2"][d])
        put(f"b1_{d}", p["b1"][d])
    put("lnfw", p["lnfw"]); put("lnfb", p["lnfb"])
    # fold BN per-channel scale into the conv weights; keep the shifts
    put("c1w", np.asarray(p["c1w"], np.float32) * np.asarray(p["bn1s"], np.float32))
    put("bn1h", p["bn1h"])
    put("bn2h", p["bn2h"])
    put("c2w", np.asarray(p["c2w"], np.float32) * np.asarray(p["bn2s"], np.float32))
    return jnp.asarray(buf)


@jax.jit
def vit_forward(img, packed_params):
    patches = to_patches(img)[0]                              # batch must be 1 (module's .view)
    patches = jnp.concatenate(
        [jnp.zeros((1, PATCH_DIM), jnp.float32), patches], axis=0)   # (SEQ, PATCH_DIM), row 0 = cls slot
    out = pl.pallas_call(
        vit_kernel,
        out_shape=jax.ShapeDtypeStruct((NUM_CLASSES, OUT_LANES), jnp.float32),
        in_specs=[pl.BlockSpec(memory_space=pltpu.MemorySpace.VMEM),
                  pl.BlockSpec(memory_space=pltpu.MemorySpace.VMEM)],
        out_specs=pl.BlockSpec(memory_space=pltpu.MemorySpace.VMEM),
    )(patches, packed_params)
    return out[:, :DIM].reshape(1, NUM_CLASSES, DIM, 1)


# ---------------- pure-JAX reference (mirrors the PyTorch forward) ------------
def _layernorm_ref(x, w, b):
    mu = jnp.mean(x, axis=-1, keepdims=True)
    var = jnp.mean((x - mu) ** 2, axis=-1, keepdims=True)
    return (x - mu) * jax.lax.rsqrt(var + LN_EPS) * w + b


def vit_reference(img, p):
    patches = to_patches(img)[0]
    x = patches @ p["wp"] + p["bp"]
    x = jnp.concatenate([p["cls"], x], axis=0) + p["pos"]
    for d in range(DEPTH):
        h = _layernorm_ref(x, p["ln1w"][d], p["ln1b"][d])
        qkv = h @ p["wqkv"][d]
        q, k, v = qkv[:, :INNER], qkv[:, INNER:2 * INNER], qkv[:, 2 * INNER:]
        outs = []
        for hh in range(HEADS):
            sl = slice(hh * DIM_HEAD, (hh + 1) * DIM_HEAD)
            dots = (q[:, sl] @ k[:, sl].T) * SCALE
            outs.append(jax.nn.softmax(dots, axis=-1) @ v[:, sl])
        o = jnp.concatenate(outs, axis=1) @ p["wo"][d] + p["bo"][d]
        x = o + x
        h = _layernorm_ref(x, p["ln2w"][d], p["ln2b"][d])
        h = jax.nn.gelu(h @ p["w1"][d] + p["b1"][d], approximate=False) @ p["w2"][d] + p["b2"][d]
        x = h + x
    cls = _layernorm_ref(x[0:1, :], p["lnfw"], p["lnfb"])
    y = jnp.maximum((p["c1w"] @ cls) * p["bn1s"] + p["bn1h"], 0.0)
    z = jnp.maximum((p["c2w"] @ y) * p["bn2s"] + p["bn2h"], 0.0)
    return z.reshape(1, NUM_CLASSES, DIM, 1)


def init_params(key):
    ks = jax.random.split(key, 12)

    def nrm(k, shape, std=0.02):
        return (std * jax.random.normal(k, shape)).astype(jnp.float32)

    p = {}
    p["wp"] = nrm(ks[0], (PATCH_DIM, DIM))
    p["bp"] = nrm(ks[1], (1, DIM))
    p["cls"] = nrm(ks[2], (1, DIM), std=1.0)          # torch.randn init
    p["pos"] = nrm(ks[3], (SEQ, DIM), std=1.0)        # torch.randn init
    p["ln1w"] = jnp.ones((DEPTH, 1, DIM), jnp.float32)
    p["ln1b"] = jnp.zeros((DEPTH, 1, DIM), jnp.float32)
    p["wqkv"] = nrm(ks[4], (DEPTH, DIM, 3 * INNER))   # to_qkv (bias=False)
    p["wo"] = nrm(ks[5], (DEPTH, INNER, DIM))         # to_out Linear
    p["bo"] = nrm(ks[6], (DEPTH, 1, DIM))
    p["ln2w"] = jnp.ones((DEPTH, 1, DIM), jnp.float32)
    p["ln2b"] = jnp.zeros((DEPTH, 1, DIM), jnp.float32)
    p["w1"] = nrm(ks[7], (DEPTH, DIM, MLP_DIM))
    p["b1"] = nrm(ks[8], (DEPTH, 1, MLP_DIM))
    p["w2"] = nrm(ks[9], (DEPTH, MLP_DIM, DIM))
    p["b2"] = nrm(ks[10], (DEPTH, 1, DIM))
    p["lnfw"] = jnp.ones((1, DIM), jnp.float32)
    p["lnfb"] = jnp.zeros((1, DIM), jnp.float32)
    # mlp_head: Conv2d(1, NC2, 1, bias=False) / BN / ReLU / Conv2d(NC2, NC, 1, bias=False) / BN / ReLU
    p["c1w"] = nrm(ks[11], (NC2, 1))
    p["c2w"] = nrm(jax.random.fold_in(key, 99), (NUM_CLASSES, NC2))
    # TODO(synk): BatchNorm2d is implemented with running statistics (inference
    # mode, mean=0/var=1/gamma=1/beta=0) folded into scale+shift; training-mode
    # batch statistics are not reproduced.
    bn1_g = jnp.ones((NC2, 1), jnp.float32); bn1_b = jnp.zeros((NC2, 1), jnp.float32)
    bn1_m = jnp.zeros((NC2, 1), jnp.float32); bn1_v = jnp.ones((NC2, 1), jnp.float32)
    p["bn1s"] = bn1_g / jnp.sqrt(bn1_v + BN_EPS)
    p["bn1h"] = bn1_b - bn1_m * p["bn1s"]
    bn2_g = jnp.ones((NUM_CLASSES, 1), jnp.float32); bn2_b = jnp.zeros((NUM_CLASSES, 1), jnp.float32)
    bn2_m = jnp.zeros((NUM_CLASSES, 1), jnp.float32); bn2_v = jnp.ones((NUM_CLASSES, 1), jnp.float32)
    p["bn2s"] = bn2_g / jnp.sqrt(bn2_v + BN_EPS)
    p["bn2h"] = bn2_b - bn2_m * p["bn2s"]
    return p


if __name__ == "__main__":
    key = jax.random.PRNGKey(0)
    kimg, kparam = jax.random.split(key)
    img = jax.random.normal(kimg, (1, CHANNELS, IMAGE_H, IMAGE_W), jnp.float32)
    params = init_params(kparam)
    packed = pack_params(params)

    out = vit_forward(img, packed)
    out = jax.block_until_ready(out)
    assert out.shape == (1, NUM_CLASSES, DIM, 1)

    ref = vit_reference(img, params)
    np.testing.assert_allclose(np.asarray(out), np.asarray(ref), rtol=2e-2, atol=2e-2)
    print("KERNEL_OK")
</pallas_src>

<mosaic_0001>
module attributes {stable_mosaic.version = 11 : i64} {
  func.func @vit_kernel(%arg0: memref<17x64xf32, #tpu.memory_space<vmem>>, %arg1: memref<456x96xf32, #tpu.memory_space<vmem>>, %arg2: memref<8x128xf32, #tpu.memory_space<vmem>>) attributes {dimension_semantics = [], scalar_prefetch = 0 : i64, scratch_operands = 0 : i64, tpu.core_type = #tpu.core_type<tc>} {
    %c0 = arith.constant 0 : index
    %c0_0 = arith.constant 0 : index
    %0 = vector.load %arg0[%c0, %c0_0] : memref<17x64xf32, #tpu.memory_space<vmem>>, vector<17x64xf32>
    %c0_1 = arith.constant 0 : index
    %c0_2 = arith.constant 0 : index
    %1 = vector.load %arg1[%c0_1, %c0_2] : memref<456x96xf32, #tpu.memory_space<vmem>>, vector<64x32xf32>
    %cst = arith.constant dense<0.000000e+00> : vector<17x32xf32>
    %2 = tpu.matmul %0, %1, %cst {dimension_numbers = #tpu.dot_dimension_numbers<[1], [0], [0], [1], [0, 0, 1, 1], [], []>} : vector<17x64xf32>, vector<64x32xf32>, vector<17x32xf32> -> vector<17x32xf32>
    %c64 = arith.constant 64 : index
    %c0_3 = arith.constant 0 : index
    %3 = vector.load %arg1[%c64, %c0_3] : memref<456x96xf32, #tpu.memory_space<vmem>>, vector<17x32xf32>
    %4 = arith.addf %2, %3 : vector<17x32xf32>
    %c248 = arith.constant 248 : index
    %c0_4 = arith.constant 0 : index
    %5 = vector.load %arg1[%c248, %c0_4] : memref<456x96xf32, #tpu.memory_space<vmem>>, vector<1x32xf32>
    %c249 = arith.constant 249 : index
    %c0_5 = arith.constant 0 : index
    %6 = vector.load %arg1[%c249, %c0_5] : memref<456x96xf32, #tpu.memory_space<vmem>>, vector<1x32xf32>
    %cst_6 = arith.constant dense<0.000000e+00> : vector<17xf32>
    %7 = vector.multi_reduction <add>, %4, %cst_6 [1] : vector<17x32xf32> to vector<17xf32>
    %8 = vector.shape_cast %7 : vector<17xf32> to vector<17x1xf32>
    %cst_7 = arith.constant 3.200000e+01 : f32
    %9 = vector.broadcast %cst_7 : f32 to vector<17x1xf32>
    %10 = arith.divf %8, %9 : vector<17x1xf32>
    %11 = arith.mulf %4, %4 : vector<17x32xf32>
    %cst_8 = arith.constant dense<0.000000e+00> : vector<17xf32>
    %12 = vector.multi_reduction <add>, %11, %cst_8 [1] : vector<17x32xf32> to vector<17xf32>
    %13 = vector.shape_cast %12 : vector<17xf32> to vector<17x1xf32>
    %cst_9 = arith.constant 3.200000e+01 : f32
    %14 = vector.broadcast %cst_9 : f32 to vector<17x1xf32>
    %15 = arith.divf %13, %14 : vector<17x1xf32>
    %16 = arith.mulf %10, %10 : vector<17x1xf32>
    %17 = arith.subf %15, %16 : vector<17x1xf32>
    %18 = vector.broadcast %10 : vector<17x1xf32> to vector<17x32xf32>
    %19 = arith.subf %4, %18 : vector<17x32xf32>
    %cst_10 = arith.constant 9.99999974E-6 : f32
    %20 = vector.broadcast %cst_10 : f32 to vector<17x1xf32>
    %21 = arith.addf %17, %20 : vector<17x1xf32>
    %22 = math.rsqrt %21 : vector<17x1xf32>
    %23 = vector.broadcast %22 : vector<17x1xf32> to vector<17x32xf32>
    %24 = arith.mulf %19, %23 : vector<17x32xf32>
    %25 = vector.broadcast %5 : vector<1x32xf32> to vector<17x32xf32>
    %26 = arith.mulf %24, %25 : vector<17x32xf32>
    %27 = vector.broadcast %6 : vector<1x32xf32> to vector<17x32xf32>
    %28 = arith.addf %26, %27 : vector<17x32xf32>
    %c88 = arith.constant 88 : index
    %c0_11 = arith.constant 0 : index
    %29 = vector.load %arg1[%c88, %c0_11] : memref<456x96xf32, #tpu.memory_space<vmem>>, vector<32x96xf32>
    %cst_12 = arith.constant dense<0.000000e+00> : vector<17x96xf32>
    %30 = tpu.matmul %28, %29, %cst_12 {dimension_numbers = #tpu.dot_dimension_numbers<[1], [0], [0], [1], [0, 0, 1, 1], [], []>} : vector<17x32xf32>, vector<32x96xf32>, vector<17x96xf32> -> vector<17x96xf32>
    %31 = vector.extract_strided_slice %30 {offsets = [0, 0], sizes = [17, 16], strides = [1, 1]} : vector<17x96xf32> to vector<17x16xf32>
    %32 = vector.extract_strided_slice %30 {offsets = [0, 32], sizes = [17, 16], strides = [1, 1]} : vector<17x96xf32> to vector<17x16xf32>
    %33 = vector.extract_strided_slice %30 {offsets = [0, 64], sizes = [17, 16], strides = [1, 1]} : vector<17x96xf32> to vector<17x16xf32>
    %cst_13 = arith.constant dense<0.000000e+00> : vector<17x17xf32>
    %34 = tpu.matmul %31, %32, %cst_13 {dimension_numbers = #tpu.dot_dimension_numbers<[1], [1], [0], [0], [0, 0, 1, 0], [], []>} : vector<17x16xf32>, vector<17x16xf32>, vector<17x17xf32> -> vector<17x17xf32>
    %cst_14 = arith.constant dense<0xFF800000> : vector<17xf32>
    %35 = vector.multi_reduction <maximumf>, %34, %cst_14 [1] : vector<17x17xf32> to vector<17xf32>
    %36 = vector.shape_cast %35 : vector<17xf32> to vector<17x1xf32>
    %37 = vector.broadcast %36 : vector<17x1xf32> to vector<17x17xf32>
    %38 = arith.subf %34, %37 : vector<17x17xf32>
    %39 = math.exp %38 : vector<17x17xf32>
    %cst_15 = arith.constant dense<0.000000e+00> : vector<17xf32>
    %40 = vector.multi_reduction <add>, %39, %cst_15 [1] : vector<17x17xf32> to vector<17xf32>
    %41 = vector.shape_cast %40 : vector<17xf32> to vector<17x1xf32>
    %42 = vector.broadcast %41 : vector<17x1xf32> to vector<17x17xf32>
    %43 = arith.divf %39, %42 : vector<17x17xf32>
    %cst_16 = arith.constant dense<0.000000e+00> : vector<17x16xf32>
    %44 = tpu.matmul %43, %33, %cst_16 {dimension_numbers = #tpu.dot_dimension_numbers<[1], [0], [0], [1], [0, 0, 1, 1], [], []>} : vector<17x17xf32>, vector<17x16xf32>, vector<17x16xf32> -> vector<17x16xf32>
    %45 = vector.extract_strided_slice %30 {offsets = [0, 16], sizes = [17, 16], strides = [1, 1]} : vector<17x96xf32> to vector<17x16xf32>
    %46 = vector.extract_strided_slice %30 {offsets = [0, 48], sizes = [17, 16], strides = [1, 1]} : vector<17x96xf32> to vector<17x16xf32>
    %47 = vector.extract_strided_slice %30 {offsets = [0, 80], sizes = [17, 16], strides = [1, 1]} : vector<17x96xf32> to vector<17x16xf32>
    %cst_17 = arith.constant dense<0.000000e+00> : vector<17x17xf32>
    %48 = tpu.matmul %45, %46, %cst_17 {dimension_numbers = #tpu.dot_dimension_numbers<[1], [1], [0], [0], [0, 0, 1, 0], [], []>} : vector<17x16xf32>, vector<17x16xf32>, vector<17x17xf32> -> vector<17x17xf32>
    %cst_18 = arith.constant dense<0xFF800000> : vector<17xf32>
    %49 = vector.multi_reduction <maximumf>, %48, %cst_18 [1] : vector<17x17xf32> to vector<17xf32>
    %50 = vector.shape_cast %49 : vector<17xf32> to vector<17x1xf32>
    %51 = vector.broadcast %50 : vector<17x1xf32> to vector<17x17xf32>
    %52 = arith.subf %48, %51 : vector<17x17xf32>
    %53 = math.exp %52 : vector<17x17xf32>
    %cst_19 = arith.constant dense<0.000000e+00> : vector<17xf32>
    %54 = vector.multi_reduction <add>, %53, %cst_19 [1] : vector<17x17xf32> to vector<17xf32>
    %55 = vector.shape_cast %54 : vector<17xf32> to vector<17x1xf32>
    %56 = vector.broadcast %55 : vector<17x1xf32> to vector<17x17xf32>
    %57 = arith.divf %53, %56 : vector<17x17xf32>
    %cst_20 = arith.constant dense<0.000000e+00> : vector<17x16xf32>
    %58 = tpu.matmul %57, %47, %cst_20 {dimension_numbers = #tpu.dot_dimension_numbers<[1], [0], [0], [1], [0, 0, 1, 1], [], []>} : vector<17x17xf32>, vector<17x16xf32>, vector<17x16xf32> -> vector<17x16xf32>
    %59 = tpu.concatenate %44, %58 in 1 : vector<17x16xf32>, vector<17x16xf32> -> vector<17x32xf32>
    %c120 = arith.constant 120 : index
    %c0_21 = arith.constant 0 : index
    %60 = vector.load %arg1[%c120, %c0_21] : memref<456x96xf32, #tpu.memory_space<vmem>>, vector<32x32xf32>
    %cst_22 = arith.constant dense<0.000000e+00> : vector<17x32xf32>
    %61 = tpu.matmul %59, %60, %cst_22 {dimension_numbers = #tpu.dot_dimension_numbers<[1], [0], [0], [1], [0, 0, 1, 1], [], []>} : vector<17x32xf32>, vector<32x32xf32>, vector<17x32xf32> -> vector<17x32xf32>
    %c250 = arith.constant 250 : index
    %c0_23 = arith.constant 0 : index
    %62 = vector.load %arg1[%c250, %c0_23] : memref<456x96xf32, #tpu.memory_space<vmem>>, vector<1x32xf32>
    %63 = vector.broadcast %62 : vector<1x32xf32> to vector<17x32xf32>
    %64 = arith.addf %61, %63 : vector<17x32xf32>
    %65 = arith.addf %64, %4 : vector<17x32xf32>
    %c251 = arith.constant 251 : index
    %c0_24 = arith.constant 0 : index
    %66 = vector.load %arg1[%c251, %c0_24] : memref<456x96xf32, #tpu.memory_space<vmem>>, vector<1x32xf32>
    %c252 = arith.constant 252 : index
    %c0_25 = arith.constant 0 : index
    %67 = vector.load %arg1[%c252, %c0_25] : memref<456x96xf32, #tpu.memory_space<vmem>>, vector<1x32xf32>
    %cst_26 = arith.constant dense<0.000000e+00> : vector<17xf32>
    %68 = vector.multi_reduction <add>, %65, %cst_26 [1] : vector<17x32xf32> to vector<17xf32>
    %69 = vector.shape_cast %68 : vector<17xf32> to vector<17x1xf32>
    %cst_27 = arith.constant 3.200000e+01 : f32
    %70 = vector.broadcast %cst_27 : f32 to vector<17x1xf32>
    %71 = arith.divf %69, %70 : vector<17x1xf32>
    %72 = arith.mulf %65, %65 : vector<17x32xf32>
    %cst_28 = arith.constant dense<0.000000e+00> : vector<17xf32>
    %73 = vector.multi_reduction <add>, %72, %cst_28 [1] : vector<17x32xf32> to vector<17xf32>
    %74 = vector.shape_cast %73 : vector<17xf32> to vector<17x1xf32>
    %cst_29 = arith.constant 3.200000e+01 : f32
    %75 = vector.broadcast %cst_29 : f32 to vector<17x1xf32>
    %76 = arith.divf %74, %75 : vector<17x1xf32>
    %77 = arith.mulf %71, %71 : vector<17x1xf32>
    %78 = arith.subf %76, %77 : vector<17x1xf32>
    %79 = vector.broadcast %71 : vector<17x1xf32> to vector<17x32xf32>
    %80 = arith.subf %65, %79 : vector<17x32xf32>
    %cst_30 = arith.constant 9.99999974E-6 : f32
    %81 = vector.broadcast %cst_30 : f32 to vector<17x1xf32>
    %82 = arith.addf %78, %81 : vector<17x1xf32>
    %83 = math.rsqrt %82 : vector<17x1xf32>
    %84 = vector.broadcast %83 : vector<17x1xf32> to vector<17x32xf32>
    %85 = arith.mulf %80, %84 : vector<17x32xf32>
    %86 = vector.broadcast %66 : vector<1x32xf32> to vector<17x32xf32>
    %87 = arith.mulf %85, %86 : vector<17x32xf32>
    %88 = vector.broadcast %67 : vector<1x32xf32> to vector<17x32xf32>
    %89 = arith.addf %87, %88 : vector<17x32xf32>
    %c152 = arith.constant 152 : index
    %c0_31 = arith.constant 0 : index
    %90 = vector.load %arg1[%c152, %c0_31] : memref<456x96xf32, #tpu.memory_space<vmem>>, vector<32x64xf32>
    %cst_32 = arith.constant dense<0.000000e+00> : vector<17x64xf32>
    %91 = tpu.matmul %89, %90, %cst_32 {dimension_numbers = #tpu.dot_dimension_numbers<[1], [0], [0], [1], [0, 0, 1, 1], [], []>} : vector<17x32xf32>, vector<32x64xf32>, vector<17x64xf32> -> vector<17x64xf32>
    %c254 = arith.constant 254 : index
    %c0_33 = arith.constant 0 : index
    %92 = vector.load %arg1[%c254, %c0_33] : memref<456x96xf32, #tpu.memory_space<vmem>>, vector<1x64xf32>
    %93 = vector.broadcast %92 : vector<1x64xf32> to vector<17x64xf32>
    %94 = arith.addf %91, %93 : vector<17x64xf32>
    %cst_34 = arith.constant 5.000000e-01 : f32
    %95 = vector.broadcast %cst_34 : f32 to vector<17x64xf32>
    %96 = arith.mulf %95, %94 : vector<17x64xf32>
    %cst_35 = arith.constant 4.471500e-02 : f32
    %97 = vector.broadcast %cst_35 : f32 to vector<17x64xf32>
    %98 = arith.mulf %97, %94 : vector<17x64xf32>
    %99 = arith.mulf %98, %94 : vector<17x64xf32>
    %100 = arith.mulf %99, %94 : vector<17x64xf32>
    %101 = arith.addf %94, %100 : vector<17x64xf32>
    %cst_36 = arith.constant 0.797884583 : f32
    %102 = vector.broadcast %cst_36 : f32 to vector<17x64xf32>
    %103 = arith.mulf %102, %101 : vector<17x64xf32>
    %104 = math.tanh %103 : vector<17x64xf32>
    %cst_37 = arith.constant 1.000000e+00 : f32
    %105 = vector.broadcast %cst_37 : f32 to vector<17x64xf32>
    %106 = arith.addf %105, %104 : vector<17x64xf32>
    %107 = arith.mulf %96, %106 : vector<17x64xf32>
    %c184 = arith.constant 184 : index
    %c0_38 = arith.constant 0 : index
    %108 = vector.load %arg1[%c184, %c0_38] : memref<456x96xf32, #tpu.memory_space<vmem>>, vector<64x32xf32>
    %cst_39 = arith.constant dense<0.000000e+00> : vector<17x32xf32>
    %109 = tpu.matmul %107, %108, %cst_39 {dimension_numbers = #tpu.dot_dimension_numbers<[1], [0], [0], [1], [0, 0, 1, 1], [], []>} : vector<17x64xf32>, vector<64x32xf32>, vector<17x32xf32> -> vector<17x32xf32>
    %c253 = arith.constant 253 : index
    %c0_40 = arith.constant 0 : index
    %110 = vector.load %arg1[%c253, %c0_40] : memref<456x96xf32, #tpu.memory_space<vmem>>, vector<1x32xf32>
    %111 = vector.broadcast %110 : vector<1x32xf32> to vector<17x32xf32>
    %112 = arith.addf %109, %111 : vector<17x32xf32>
    %113 = arith.addf %112, %65 : vector<17x32xf32>
    %c416 = arith.constant 416 : index
    %c0_41 = arith.constant 0 : index
    %114 = vector.load %arg1[%c416, %c0_41] : memref<456x96xf32, #tpu.memory_space<vmem>>, vector<1x32xf32>
    %c417 = arith.constant 417 : index
    %c0_42 = arith.constant 0 : index
    %115 = vector.load %arg1[%c417, %c0_42] : memref<456x96xf32, #tpu.memory_space<vmem>>, vector<1x32xf32>
    %cst_43 = arith.constant dense<0.000000e+00> : vector<17xf32>
    %116 = vector.multi_reduction <add>, %113, %cst_43 [1] : vector<17x32xf32> to vector<17xf32>
    %117 = vector.shape_cast %116 : vector<17xf32> to vector<17x1xf32>
    %cst_44 = arith.constant 3.200000e+01 : f32
    %118 = vector.broadcast %cst_44 : f32 to vector<17x1xf32>
    %119 = arith.divf %117, %118 : vector<17x1xf32>
    %120 = arith.mulf %113, %113 : vector<17x32xf32>
    %cst_45 = arith.constant dense<0.000000e+00> : vector<17xf32>
    %121 = vector.multi_reduction <add>, %120, %cst_45 [1] : vector<17x32xf32> to vector<17xf32>
    %122 = vector.shape_cast %121 : vector<17xf32> to vector<17x1xf32>
    %cst_46 = arith.constant 3.200000e+01 : f32
    %123 = vector.broadcast %cst_46 : f32 to vector<17x1xf32>
    %124 = arith.divf %122, %123 : vector<17x1xf32>
    %125 = arith.mulf %119, %119 : vector<17x1xf32>
    %126 = arith.subf %124, %125 : vector<17x1xf32>
    %127 = vector.broadcast %119 : vector<17x1xf32> to vector<17x32xf32>
    %128 = arith.subf %113, %127 : vector<17x32xf32>
    %cst_47 = arith.constant 9.99999974E-6 : f32
    %129 = vector.broadcast %cst_47 : f32 to vector<17x1xf32>
    %130 = arith.addf %126, %129 : vector<17x1xf32>
    %131 = math.rsqrt %130 : vector<17x1xf32>
    %132 = vector.broadcast %131 : vector<17x1xf32> to vector<17x32xf32>
    %133 = arith.mulf %128, %132 : vector<17x32xf32>
    %134 = vector.broadcast %114 : vector<1x32xf32> to vector<17x32xf32>
    %135 = arith.mulf %133, %134 : vector<17x32xf32>
    %136 = vector.broadcast %115 : vector<1x32xf32> to vector<17x32xf32>
    %137 = arith.addf %135, %136 : vector<17x32xf32>
    %c256 = arith.constant 256 : index
    %c0_48 = arith.constant 0 : index
    %138 = vector.load %arg1[%c256, %c0_48] : memref<456x96xf32, #tpu.memory_space<vmem>>, vector<32x96xf32>
    %cst_49 = arith.constant dense<0.000000e+00> : vector<17x96xf32>
    %139 = tpu.matmul %137, %138, %cst_49 {dimension_numbers = #tpu.dot_dimension_numbers<[1], [0], [0], [1], [0, 0, 1, 1], [], []>} : vector<17x32xf32>, vector<32x96xf32>, vector<17x96xf32> -> vector<17x96xf32>
    %140 = vector.extract_strided_slice %139 {offsets = [0, 0], sizes = [1, 96], strides = [1, 1]} : vector<17x96xf32> to vector<1x96xf32>
    %141 = vector.extract_strided_slice %140 {offsets = [0, 0], sizes = [1, 16], strides = [1, 1]} : vector<1x96xf32> to vector<1x16xf32>
    %142 = vector.extract_strided_slice %139 {offsets = [0, 32], sizes = [17, 16], strides = [1, 1]} : vector<17x96xf32> to vector<17x16xf32>
    %143 = vector.extract_strided_slice %139 {offsets = [0, 64], sizes = [17, 16], strides = [1, 1]} : vector<17x96xf32> to vector<17x16xf32>
    %cst_50 = arith.constant dense<0.000000e+00> : vector<1x17xf32>
    %144 = tpu.matmul %141, %142, %cst_50 {dimension_numbers = #tpu.dot_dimension_numbers<[1], [1], [0], [0], [0, 0, 1, 0], [], []>} : vector<1x16xf32>, vector<17x16xf32>, vector<1x17xf32> -> vector<1x17xf32>
    %cst_51 = arith.constant dense<0xFF800000> : vector<1xf32>
    %145 = vector.multi_reduction <maximumf>, %144, %cst_51 [1] : vector<1x17xf32> to vector<1xf32>
    %146 = vector.shape_cast %145 : vector<1xf32> to vector<1x1xf32>
    %147 = vector.broadcast %146 : vector<1x1xf32> to vector<1x17xf32>
    %148 = arith.subf %144, %147 : vector<1x17xf32>
    %149 = math.exp %148 : vector<1x17xf32>
    %cst_52 = arith.constant dense<0.000000e+00> : vector<1xf32>
    %150 = vector.multi_reduction <add>, %149, %cst_52 [1] : vector<1x17xf32> to vector<1xf32>
    %151 = vector.shape_cast %150 : vector<1xf32> to vector<1x1xf32>
    %152 = vector.broadcast %151 : vector<1x1xf32> to vector<1x17xf32>
    %153 = arith.divf %149, %152 : vector<1x17xf32>
    %cst_53 = arith.constant dense<0.000000e+00> : vector<1x16xf32>
    %154 = tpu.matmul %153, %143, %cst_53 {dimension_numbers = #tpu.dot_dimension_numbers<[1], [0], [0], [1], [0, 0, 1, 1], [], []>} : vector<1x17xf32>, vector<17x16xf32>, vector<1x16xf32> -> vector<1x16xf32>
    %155 = vector.extract_strided_slice %140 {offsets = [0, 16], sizes = [1, 16], strides = [1, 1]} : vector<1x96xf32> to vector<1x16xf32>
    %156 = vector.extract_strided_slice %139 {offsets = [0, 48], sizes = [17, 16], strides = [1, 1]} : vector<17x96xf32> to vector<17x16xf32>
    %157 = vector.extract_strided_slice %139 {offsets = [0, 80], sizes = [17, 16], strides = [1, 1]} : vector<17x96xf32> to vector<17x16xf32>
    %cst_54 = arith.constant dense<0.000000e+00> : vector<1x17xf32>
    %158 = tpu.matmul %155, %156, %cst_54 {dimension_numbers = #tpu.dot_dimension_numbers<[1], [1], [0], [0], [0, 0, 1, 0], [], []>} : vector<1x16xf32>, vector<17x16xf32>, vector<1x17xf32> -> vector<1x17xf32>
    %cst_55 = arith.constant dense<0xFF800000> : vector<1xf32>
    %159 = vector.multi_reduction <maximumf>, %158, %cst_55 [1] : vector<1x17xf32> to vector<1xf32>
    %160 = vector.shape_cast %159 : vector<1xf32> to vector<1x1xf32>
    %161 = vector.broadcast %160 : vector<1x1xf32> to vector<1x17xf32>
    %162 = arith.subf %158, %161 : vector<1x17xf32>
    %163 = math.exp %162 : vector<1x17xf32>
    %cst_56 = arith.constant dense<0.000000e+00> : vector<1xf32>
    %164 = vector.multi_reduction <add>, %163, %cst_56 [1] : vector<1x17xf32> to vector<1xf32>
    %165 = vector.shape_cast %164 : vector<1xf32> to vector<1x1xf32>
    %166 = vector.broadcast %165 : vector<1x1xf32> to vector<1x17xf32>
    %167 = arith.divf %163, %166 : vector<1x17xf32>
    %cst_57 = arith.constant dense<0.000000e+00> : vector<1x16xf32>
    %168 = tpu.matmul %167, %157, %cst_57 {dimension_numbers = #tpu.dot_dimension_numbers<[1], [0], [0], [1], [0, 0, 1, 1], [], []>} : vector<1x17xf32>, vector<17x16xf32>, vector<1x16xf32> -> vector<1x16xf32>
    %169 = tpu.concatenate %154, %168 in 1 : vector<1x16xf32>, vector<1x16xf32> -> vector<1x32xf32>
    %c288 = arith.constant 288 : index
    %c0_58 = arith.constant 0 : index
    %170 = vector.load %arg1[%c288, %c0_58] : memref<456x96xf32, #tpu.memory_space<vmem>>, vector<32x32xf32>
    %cst_59 = arith.constant dense<0.000000e+00> : vector<1x32xf32>
    %171 = tpu.matmul %169, %170, %cst_59 {dimension_numbers = #tpu.dot_dimension_numbers<[1], [0], [0], [1], [0, 0, 1, 1], [], []>} : vector<1x32xf32>, vector<32x32xf32>, vector<1x32xf32> -> vector<1x32xf32>
    %c418 = arith.constant 418 : index
    %c0_60 = arith.constant 0 : index
    %172 = vector.load %arg1[%c418, %c0_60] : memref<456x96xf32, #tpu.memory_space<vmem>>, vector<1x32xf32>
    %173 = arith.addf %171, %172 : vector<1x32xf32>
    %174 = vector.extract_strided_slice %113 {offsets = [0, 0], sizes = [1, 32], strides = [1, 1]} : vector<17x32xf32> to vector<1x32xf32>
    %175 = arith.addf %173, %174 : vector<1x32xf32>
    %c419 = arith.constant 419 : index
    %c0_61 = arith.constant 0 : index
    %176 = vector.load %arg1[%c419, %c0_61] : memref<456x96xf32, #tpu.memory_space<vmem>>, vector<1x32xf32>
    %c420 = arith.constant 420 : index
    %c0_62 = arith.constant 0 : index
    %177 = vector.load %arg1[%c420, %c0_62] : memref<456x96xf32, #tpu.memory_space<vmem>>, vector<1x32xf32>
    %cst_63 = arith.constant dense<0.000000e+00> : vector<1xf32>
    %178 = vector.multi_reduction <add>, %175, %cst_63 [1] : vector<1x32xf32> to vector<1xf32>
    %179 = vector.shape_cast %178 : vector<1xf32> to vector<1x1xf32>
    %cst_64 = arith.constant 3.200000e+01 : f32
    %180 = vector.broadcast %cst_64 : f32 to vector<1x1xf32>
    %181 = arith.divf %179, %180 : vector<1x1xf32>
    %182 = arith.mulf %175, %175 : vector<1x32xf32>
    %cst_65 = arith.constant dense<0.000000e+00> : vector<1xf32>
    %183 = vector.multi_reduction <add>, %182, %cst_65 [1] : vector<1x32xf32> to vector<1xf32>
    %184 = vector.shape_cast %183 : vector<1xf32> to vector<1x1xf32>
    %cst_66 = arith.constant 3.200000e+01 : f32
    %185 = vector.broadcast %cst_66 : f32 to vector<1x1xf32>
    %186 = arith.divf %184, %185 : vector<1x1xf32>
    %187 = arith.mulf %181, %181 : vector<1x1xf32>
    %188 = arith.subf %186, %187 : vector<1x1xf32>
    %189 = vector.broadcast %181 : vector<1x1xf32> to vector<1x32xf32>
    %190 = arith.subf %175, %189 : vector<1x32xf32>
    %cst_67 = arith.constant 9.99999974E-6 : f32
    %191 = vector.broadcast %cst_67 : f32 to vector<1x1xf32>
    %192 = arith.addf %188, %191 : vector<1x1xf32>
    %193 = math.rsqrt %192 : vector<1x1xf32>
    %194 = vector.broadcast %193 : vector<1x1xf32> to vector<1x32xf32>
    %195 = arith.mulf %190, %194 : vector<1x32xf32>
    %196 = arith.mulf %195, %176 : vector<1x32xf32>
    %197 = arith.addf %196, %177 : vector<1x32xf32>
    %c320 = arith.constant 320 : index
    %c0_68 = arith.constant 0 : index
    %198 = vector.load %arg1[%c320, %c0_68] : memref<456x96xf32, #tpu.memory_space<vmem>>, vector<32x64xf32>
    %cst_69 = arith.constant dense<0.000000e+00> : vector<1x64xf32>
    %199 = tpu.matmul %197, %198, %cst_69 {dimension_numbers = #tpu.dot_dimension_numbers<[1], [0], [0], [1], [0, 0, 1, 1], [], []>} : vector<1x32xf32>, vector<32x64xf32>, vector<1x64xf32> -> vector<1x64xf32>
    %c422 = arith.constant 422 : index
    %c0_70 = arith.constant 0 : index
    %200 = vector.load %arg1[%c422, %c0_70] : memref<456x96xf32, #tpu.memory_space<vmem>>, vector<1x64xf32>
    %201 = arith.addf %199, %200 : vector<1x64xf32>
    %cst_71 = arith.constant 5.000000e-01 : f32
    %202 = vector.broadcast %cst_71 : f32 to vector<1x64xf32>
    %203 = arith.mulf %202, %201 : vector<1x64xf32>
    %cst_72 = arith.constant 4.471500e-02 : f32
    %204 = vector.broadcast %cst_72 : f32 to vector<1x64xf32>
    %205 = arith.mulf %204, %201 : vector<1x64xf32>
    %206 = arith.mulf %205, %201 : vector<1x64xf32>
    %207 = arith.mulf %206, %201 : vector<1x64xf32>
    %208 = arith.addf %201, %207 : vector<1x64xf32>
    %cst_73 = arith.constant 0.797884583 : f32
    %209 = vector.broadcast %cst_73 : f32 to vector<1x64xf32>
    %210 = arith.mulf %209, %208 : vector<1x64xf32>
    %211 = math.tanh %210 : vector<1x64xf32>
    %cst_74 = arith.constant 1.000000e+00 : f32
    %212 = vector.broadcast %cst_74 : f32 to vector<1x64xf32>
    %213 = arith.addf %212, %211 : vector<1x64xf32>
    %214 = arith.mulf %203, %213 : vector<1x64xf32>
    %c352 = arith.constant 352 : index
    %c0_75 = arith.constant 0 : index
    %215 = vector.load %arg1[%c352, %c0_75] : memref<456x96xf32, #tpu.memory_space<vmem>>, vector<64x32xf32>
    %cst_76 = arith.constant dense<0.000000e+00> : vector<1x32xf32>
    %216 = tpu.matmul %214, %215, %cst_76 {dimension_numbers = #tpu.dot_dimension_numbers<[1], [0], [0], [1], [0, 0, 1, 1], [], []>} : vector<1x64xf32>, vector<64x32xf32>, vector<1x32xf32> -> vector<1x32xf32>
    %c421 = arith.constant 421 : index
    %c0_77 = arith.constant 0 : index
    %217 = vector.load %arg1[%c421, %c0_77] : memref<456x96xf32, #tpu.memory_space<vmem>>, vector<1x32xf32>
    %218 = arith.addf %216, %217 : vector<1x32xf32>
    %219 = arith.addf %218, %175 : vector<1x32xf32>
    %c423 = arith.constant 423 : index
    %c0_78 = arith.constant 0 : index
    %220 = vector.load %arg1[%c423, %c0_78] : memref<456x96xf32, #tpu.memory_space<vmem>>, vector<1x32xf32>
    %c424 = arith.constant 424 : index
    %c0_79 = arith.constant 0 : index
    %221 = vector.load %arg1[%c424, %c0_79] : memref<456x96xf32, #tpu.memory_space<vmem>>, vector<1x32xf32>
    %cst_80 = arith.constant dense<0.000000e+00> : vector<1xf32>
    %222 = vector.multi_reduction <add>, %219, %cst_80 [1] : vector<1x32xf32> to vector<1xf32>
    %223 = vector.shape_cast %222 : vector<1xf32> to vector<1x1xf32>
    %cst_81 = arith.constant 3.200000e+01 : f32
    %224 = vector.broadcast %cst_81 : f32 to vector<1x1xf32>
    %225 = arith.divf %223, %224 : vector<1x1xf32>
    %226 = arith.mulf %219, %219 : vector<1x32xf32>
    %cst_82 = arith.constant dense<0.000000e+00> : vector<1xf32>
    %227 = vector.multi_reduction <add>, %226, %cst_82 [1] : vector<1x32xf32> to vector<1xf32>
    %228 = vector.shape_cast %227 : vector<1xf32> to vector<1x1xf32>
    %cst_83 = arith.constant 3.200000e+01 : f32
    %229 = vector.broadcast %cst_83 : f32 to vector<1x1xf32>
    %230 = arith.divf %228, %229 : vector<1x1xf32>
    %231 = arith.mulf %225, %225 : vector<1x1xf32>
    %232 = arith.subf %230, %231 : vector<1x1xf32>
    %233 = vector.broadcast %225 : vector<1x1xf32> to vector<1x32xf32>
    %234 = arith.subf %219, %233 : vector<1x32xf32>
    %cst_84 = arith.constant 9.99999974E-6 : f32
    %235 = vector.broadcast %cst_84 : f32 to vector<1x1xf32>
    %236 = arith.addf %232, %235 : vector<1x1xf32>
    %237 = math.rsqrt %236 : vector<1x1xf32>
    %238 = vector.broadcast %237 : vector<1x1xf32> to vector<1x32xf32>
    %239 = arith.mulf %234, %238 : vector<1x32xf32>
    %240 = arith.mulf %239, %220 : vector<1x32xf32>
    %241 = arith.addf %240, %221 : vector<1x32xf32>
    %c425 = arith.constant 425 : index
    %c0_85 = arith.constant 0 : index
    %242 = vector.load %arg1[%c425, %c0_85] : memref<456x96xf32, #tpu.memory_space<vmem>>, vector<4x1xf32>
    %243 = vector.broadcast %242 : vector<4x1xf32> to vector<4x32xf32>
    %244 = vector.broadcast %241 : vector<1x32xf32> to vector<4x32xf32>
    %245 = arith.mulf %243, %244 : vector<4x32xf32>
    %c429 = arith.constant 429 : index
    %c0_86 = arith.constant 0 : index
    %246 = vector.load %arg1[%c429, %c0_86] : memref<456x96xf32, #tpu.memory_space<vmem>>, vector<4x1xf32>
    %247 = vector.broadcast %246 : vector<4x1xf32> to vector<4x32xf32>
    %248 = arith.addf %245, %247 : vector<4x32xf32>
    %cst_87 = arith.constant 0.000000e+00 : f32
    %249 = vector.broadcast %cst_87 : f32 to vector<4x32xf32>
    %250 = arith.maximumf %248, %249 : vector<4x32xf32>
    %c448 = arith.constant 448 : index
    %c0_88 = arith.constant 0 : index
    %251 = vector.load %arg1[%c448, %c0_88] : memref<456x96xf32, #tpu.memory_space<vmem>>, vector<8x4xf32>
    %cst_89 = arith.constant dense<0.000000e+00> : vector<8x32xf32>
    %252 = tpu.matmul %251, %250, %cst_89 {dimension_numbers = #tpu.dot_dimension_numbers<[1], [0], [0], [1], [0, 0, 1, 1], [], []>} : vector<8x4xf32>, vector<4x32xf32>, vector<8x32xf32> -> vector<8x32xf32>
    %c433 = arith.constant 433 : index
    %c0_90 = arith.constant 0 : index
    %253 = vector.load %arg1[%c433, %c0_90] : memref<456x96xf32, #tpu.memory_space<vmem>>, vector<8x1xf32>
    %254 = vector.broadcast %253 : vector<8x1xf32> to vector<8x32xf32>
    %255 = arith.addf %252, %254 : vector<8x32xf32>
    %cst_91 = arith.constant 0.000000e+00 : f32
    %256 = vector.broadcast %cst_91 : f32 to vector<8x32xf32>
    %257 = arith.maximumf %255, %256 : vector<8x32xf32>
    %cst_92 = arith.constant 0.000000e+00 : f32
    %258 = vector.broadcast %cst_92 : f32 to vector<8x96xf32>
    %259 = tpu.concatenate %257, %258 in 1 : vector<8x32xf32>, vector<8x96xf32> -> vector<8x128xf32>
    %c0_93 = arith.constant 0 : index
    %c0_94 = arith.constant 0 : index
    %260 = vector.load %arg2[%c0_93, %c0_94] : memref<8x128xf32, #tpu.memory_space<vmem>>, vector<8x128xf32>
    tpu.vector_store %arg2[%c0_93, %c0_94], %259 {strides = array<i32>} : memref<8x128xf32, #tpu.memory_space<vmem>>, vector<8x128xf32>,
    return
  }
}

</mosaic_0001>

<bundles_post_ra>
// kernel: vit_forward.1
= control target key start
LH: loop header
LB: loop body
LE: loop exit
PB: predicated region body
PF: predicated region fallthrough
CT: control target
= control target key end

     0   :  { %s2009_s0 = inlined_call_operand.vmem [shape: f32[17,64], index: 0, kind: input, shape index: {}]   ;;  %s2010_s1 = inlined_call_operand.vmem [shape: f32[456,96], index: 1, kind: input, shape index: {}]   ;;  %s2011_s2 = inlined_call_operand.hbm [shape: f32[8,128], index: 2, kind: output, shape index: {}]  }
   0x1   :  { %v22_v0 = vld [vmem:[%s2010_s1 + $0x38] sm:$0xff]  ;;  %v21_v1 = vld [vmem:[%s2010_s1 + $0x30] sm:$0xff]  ;;  %v20_v2 = vld [vmem:[%s2010_s1 + $0x28] sm:$0xff] }
   0x2   :  { %44 = vmatpush.msra.mxu0 %v22_v0  ;;  %v19_v3 = vld [vmem:[%s2010_s1 + $0x20] sm:$0xff]  ;;  %v18_v4 = vld [vmem:[%s2010_s1 + $0x18] sm:$0xff] }
   0x4   :  { %45 = vmatpush.msra.mxu0 %v21_v1 }
   0x6   :  { %46 = vmatpush.msra.mxu0 %v20_v2 }
   0x8   :  { %47 = vmatpush.msra.mxu0 %v19_v3 }
   0x9   :  { %7 = vsyncpa [#allocation3], 0  ;;  %v17_v5 = vld [vmem:[%s2010_s1 + $0x10] sm:$0xff]  ;;  %v16_v6 = vld [vmem:[%s2010_s1 + $0x8] sm:$0xff]  ;;  %vm26_vm0 = vcmask 523264   ;;  %vm64_vm1 = vcmask 261120  }
   0xa   :  { %48 = vmatpush.msra.mxu0 %v18_v4  ;;  %v15_v7 = vld [vmem:[%s2010_s1] sm:$0xff]  ;;  %v13_v9 = vld [vmem:[%s2009_s0 + $0x8] sm:$0xff]  ;;  %v14_v10 = vld [vmem:[%s2009_s0 + $0x10] sm:$0x1]  ;;  %vm71_vm2 = vcmask 253952   ;;  %v1508_v29 = vmov 32.0  }
   0xb   :  { %v12_v8 = vld [vmem:[%s2009_s0] sm:$0xff]  ;;  %v24_v15 = vld [vmem:[%s2010_s1 + $0x48] sm:$0xff]  ;;  %v25_v21 = vld [vmem:[%s2010_s1 + $0x50] sm:$0x1]  ;;  %1418 = vrcp.f32 %v1508_v29  ;;  %s1509_s20 = smov 96   ;;  %vm201_vm13 = vcmask 130048  }
   0xc   :  { %49 = vmatpush.msra.mxu0 %v17_v5  ;;  %v23_v11 = vld [vmem:[%s2010_s1 + $0x40] sm:$0xff]  ;;  %v156_v35 = vld [vmem:[%s2010_s1 + $0x70] sm:$0xff]  ;;  %v155_v37 = vld [vmem:[%s2010_s1 + $0x68] sm:$0xff]  ;;  %vm240_vm14 = vcmask 138240   ;;  %vm247_vm15 = vcmask 131072   ;;  %s1510_s21 = smov 80  }
   0xd   :  { %178 = vmatpush.msra.mxu1 %v156_v35  ;;  %v154_v39 = vld [vmem:[%s2010_s1 + $0x60] sm:$0xff]  ;;  %v153_v41 = vld [vmem:[%s2010_s1 + $0x58] sm:$0xff]  ;;  %s1511_s22 = smov 64   ;;  %s1512_s23 = smov 112  }
   0xe   :  { %50 = vmatpush.msra.mxu0 %v16_v6  ;;  %v1409_v6 = vld [vmem:[%s2010_s1 + $0xf8] ss:$0 sm:$0xff]  ;;  %s1513_s24 = smov 48   ;;  %s1514_s25 = smov 16  }
   0xf   :  { %179 = vmatpush.msra.mxu1 %v155_v37  ;;  %s1516_s30 = smov [#allocation2]  }
  0x10   :  { %51 = vmatpush.msra.mxu0 %v15_v7  ;;  %s1311_s3 = sshll.u32 %s1516_s30, 4  ;;  %s1312_s3 = int_to_ptr.vmem [resolvable:$true] %s1311_s3 }
  0x11   :  { %1322 = vmatmul.msk.f32.vlgmr.msra.gmra.mxu0 %vm26_vm0, %v12_v8  ;;  %v1419_v30 = vpop.eup %1418  ;;  %180 = vmatpush.msra.mxu1 %v154_v39 }
  0x12   :  { %v76_v31 = vmul.f32 32.0, %v1419_v30  ;;  %vm80_vm3 = vweird.f32 %v1419_v30 }
  0x13   :  { %181 = vmatpush.msra.mxu1 %v153_v41 }
  0x14   :  { %v77_v32 = vsub.f32 1.0, %v76_v31 }
  0x16   :  { %v78_v33 = vmul.f32 %v1419_v30, %v77_v32 }
  0x18   :  { %v79_v34 = vadd.f32 %v1419_v30, %v78_v33 }
  0x19   :  { %1323 = vmatmul.msk.f32.gmra.mxu0 %vm26_vm0, %v13_v9 }
  0x1a   :  { %v1604_v38 = vsel %vm80_vm3, %v1419_v30, %v79_v34  ;;  %vm331_vm3 = vcmask 1040384  }
  0x21   :  { %1324 = vmatmul.msk.f32.gmra.mxu0 %vm26_vm0, %v14_v10  ;;  %v1410_v10 = vld [vmem:[%s2010_s1 + $0xf9] ss:$0 sm:$0xff] }
  0x8e   :  { %v53_v12 = vpop.f32.mrf.mxu0 }
  0x8f   :  { %v1571_v13 = vadd.f32 %v53_v12, %v23_v11 }
  0x91   :  { %v65_v14 = vsel %vm64_vm1, %v1571_v13, 0.0  ;;  %v85_v16 = vmul.f32 %v1571_v13, %v1571_v13 }
  0x92   :  { %66 = vadd.xlane.f32.xlu0 %v65_v14 }
  0x93   :  { %v88_v20 = vsel %vm64_vm1, %v85_v16, 0.0 }
  0x96   :  { %v56_v17 = vpop.f32.mrf.mxu0 }
  0x97   :  { %v1580_v18 = vadd.f32 %v56_v17, %v24_v15 }
  0x99   :  { %v68_v19 = vsel %vm64_vm1, %v1580_v18, 0.0  ;;  %v86_v22 = vmul.f32 %v1580_v18, %v1580_v18 }
  0x9a   :  { %69 = vadd.xlane.f32.xlu1 %v68_v19  ;;  %89 = vadd.xlane.f32.xlu0 %v88_v20 }
  0x9b   :  { %v91_v26 = vsel %vm64_vm1, %v86_v22, 0.0 }
  0x9e   :  { %v59_v23 = vpop.f32.mrf.mxu0 }
  0x9f   :  { %v1590_v24 = vadd.f32 %v59_v23, %v25_v21 }
  0xa1   :  { %v72_v25 = vsel %vm71_vm2, %v1590_v24, 0.0  ;;  %v87_v27 = vmul.f32 %v1590_v24, %v1590_v24 }
  0xa2   :  { %73 = vadd.xlane.f32.xlu2 %v72_v25  ;;  %92 = vadd.xlane.f32.xlu1 %v91_v26 }
  0xa3   :  { %v94_v28 = vsel %vm71_vm2, %v87_v27, 0.0 }
  0xaa   :  { %95 = vadd.xlane.f32.xlu2 %v94_v28 }
 0x105   :  { %v67_v36 = vpop.xlane.xlu0 %66 }
 0x106   :  { %v82_v40 = vmul.f32 %v1604_v38, %v67_v36 }
 0x108   :  { %v100_v44 = vmul.f32 %v82_v40, %v82_v40  ;;  %v106_v5 = vsub.f32 %v1571_v13, %v82_v40 }
 0x10d   :  { %v70_v42 = vpop.xlane.xlu1 %69  ;;  %v90_v43 = vpop.xlane.xlu0 %89 }
 0x10e   :  { %v97_v45 = vmul.f32 %v90_v43, %v1604_v38  ;;  %v83_v47 = vmul.f32 %v1604_v38, %v70_v42 }
 0x110   :  { %v103_v46 = vsub.f32 %v97_v45, %v100_v44  ;;  %v101_v51 = vmul.f32 %v83_v47, %v83_v47  ;;  %v107_v20 = vsub.f32 %v1580_v18, %v83_v47 }
 0x112   :  { %v109_v48 = vadd.f32 1e-05, %v103_v46 }
 0x114   :  { %1420 = vrsqrt.f32 %v109_v48  ;;  %vm118_vm5 = vweird.f32 %v109_v48 }
 0x115   :  { %v74_v49 = vpop.xlane.xlu2 %73  ;;  %v93_v50 = vpop.xlane.xlu1 %92 }
 0x116   :  { %v98_v52 = vmul.f32 %v93_v50, %v1604_v38  ;;  %v84_v55 = vmul.f32 %v1604_v38, %v74_v49 }
 0x118   :  { %v104_v53 = vsub.f32 %v98_v52, %v101_v51  ;;  %v102_v60 = vmul.f32 %v84_v55, %v84_v55  ;;  %v108_v30 = vsub.f32 %v1590_v24, %v84_v55 }
 0x11a   :  { %v1421_v54 = vpop.eup %1420  ;;  %v110_v56 = vadd.f32 1e-05, %v104_v53 }
 0x11b   :  { %v113_v57 = vmul.f32 %v1421_v54, %v109_v48  ;;  %vm119_vm4 = vweird.f32 %v1421_v54 }
 0x11c   :  { %1422 = vrsqrt.f32 %v110_v56  ;;  %vm120_vm6 = vmor %vm118_vm5, %vm119_vm4  ;;  %vm128_vm8 = vweird.f32 %v110_v56 }
 0x11d   :  { %v114_v58 = vmul.f32 %v1421_v54, %v113_v57  ;;  %v96_v59 = vpop.xlane.xlu2 %95 }
 0x11e   :  { %v99_v61 = vmul.f32 %v96_v59, %v1604_v38 }
 0x11f   :  { %v115_v62 = vmul.f32 0.5, %v114_v58 }
 0x120   :  { %v105_v63 = vsub.f32 %v99_v61, %v102_v60 }
 0x121   :  { %v116_v0 = vsub.f32 1.5, %v115_v62 }
 0x122   :  { %v1423_v1 = vpop.eup %1422  ;;  %v111_v2 = vadd.f32 1e-05, %v105_v63 }
 0x123   :  { %v117_v3 = vmul.f32 %v1421_v54, %v116_v0  ;;  %v123_v4 = vmul.f32 %v1423_v1, %v110_v56  ;;  %vm129_vm7 = vweird.f32 %v1423_v1 }
 0x124   :  { %1424 = vrsqrt.f32 %v111_v2  ;;  %vm130_vm9 = vmor %vm128_vm8, %vm129_vm7  ;;  %vm138_vm11 = vweird.f32 %v111_v2 }
 0x125   :  { %v124_v7 = vmul.f32 %v1423_v1, %v123_v4  ;;  %v121_v8 = vsel %vm120_vm6, %v1421_v54, %v117_v3 }
 0x126   :  { %v142_v9 = vmul.f32 %v121_v8, %v106_v5 }
 0x127   :  { %v125_v11 = vmul.f32 0.5, %v124_v7 }
 0x128   :  { %v146_v12 = vmul.f32 %v1409_v6, %v142_v9 }
 0x129   :  { %v126_v14 = vsub.f32 1.5, %v125_v11 }
 0x12a   :  { %v1425_v15 = vpop.eup %1424  ;;  %v150_v16 = vadd.f32 %v1410_v10, %v146_v12 }
 0x12b   :  { %v127_v17 = vmul.f32 %v1423_v1, %v126_v14  ;;  %v133_v19 = vmul.f32 %v1425_v15, %v111_v2  ;;  %vm139_vm10 = vweird.f32 %v1425_v15 }
 0x12c   :  { %1325 = vmatmul.msk.f32.vlgmr.msra.gmra.mxu1 %vm64_vm1, %v150_v16  ;;  %vm140_vm12 = vmor %vm138_vm11, %vm139_vm10 }
 0x12d   :  { %v134_v21 = vmul.f32 %v1425_v15, %v133_v19  ;;  %v131_v22 = vsel %vm130_vm9, %v1423_v1, %v127_v17 }
 0x12e   :  { %v143_v23 = vmul.f32 %v131_v22, %v107_v20 }
 0x12f   :  { %v135_v25 = vmul.f32 0.5, %v134_v21 }
 0x130   :  { %v147_v26 = vmul.f32 %v1409_v6, %v143_v23 }
 0x131   :  { %v136_v27 = vsub.f32 1.5, %v135_v25 }
 0x132   :  { %v151_v28 = vadd.f32 %v1410_v10, %v147_v26 }
 0x133   :  { %v137_v29 = vmul.f32 %v1425_v15, %v136_v27 }
 0x134   :  { %1326 = vmatmul.msk.f32.gmra.mxu1 %vm64_vm1, %v151_v28 }
 0x135   :  { %v141_v31 = vsel %vm140_vm12, %v1425_v15, %v137_v29 }
 0x136   :  { %v144_v32 = vmul.f32 %v141_v31, %v108_v30 }
 0x138   :  { %v148_v33 = vmul.f32 %v1409_v6, %v144_v32 }
 0x13a   :  { %v152_v34 = vadd.f32 %v1410_v10, %v148_v33 }
 0x13c   :  { %1327 = vmatmul.msk.f32.gmra.mxu1 %vm64_vm1, %v152_v34 }
 0x1a9   :  { %v1630_v35 = vpop.f32.mrf.mxu1 }
 0x1aa   :  { %195 = vrot.lane.b32.xlu2 %v1630_v35, %s1509_s20 }
 0x1b1   :  { %v186_v36 = vpop.f32.mrf.mxu1 }
 0x1b2   :  { %197 = vrot.lane.b32.xlu1 %v186_v36, %s1509_s20  ;;  %v1653_v48 = vpack.i.bf16 %v1630_v35, %v186_v36 }
 0x1b9   :  { %v1635_v37 = vpop.f32.mrf.mxu1 }
 0x1ba   :  { %199 = vrot.lane.b32.xlu0 %v1635_v37, %s1509_s20 }
 0x204   :  { %v196_v41 = vpop.permute.xlu2 %195 }
 0x224   :  { %v198_v40 = vpop.permute.xlu1 %197 }
 0x22c   :  { %v200_v39 = vpop.permute.xlu0 %199 }
 0x22d   :  { %1328 = vmatpush.xpose.msk.msra.mxu2 %vm201_vm13, %v200_v39 }
 0x231   :  { %1329 = vmatpush.xpose.msk.msra.mxu2 %vm201_vm13, %v198_v40 }
 0x235   :  { %1330 = vmatpush.xpose.msk.msra.mxu2 %vm201_vm13, %v196_v41 }
 0x238   :  { %1331 = vmatmul.msk.f32.vlgmr.msra.gmra.mxu2 %vm201_vm13, %v1630_v35 }
 0x240   :  { %1332 = vmatmul.msk.f32.gmra.mxu2 %vm201_vm13, %v186_v36 }
 0x248   :  { %1333 = vmatmul.msk.f32.gmra.mxu2 %vm201_vm13, %v1635_v37 }
 0x2bb   :  { %v231_v42 = vpop.f32.mrf.mxu2 }
 0x2bc   :  { %v241_v43 = vsel %vm240_vm14, %v231_v42, -inf }
 0x2bd   :  { %242 = vmax.xlane.f32.xlu0 %v241_v43 }
 0x2c3   :  { %v234_v44 = vpop.f32.mrf.mxu2 }
 0x2c4   :  { %v244_v45 = vsel %vm240_vm14, %v234_v44, -inf }
 0x2c5   :  { %245 = vmax.xlane.f32.xlu2 %v244_v45 }
 0x2cb   :  { %v237_v46 = vpop.f32.mrf.mxu2 }
 0x2cc   :  { %v248_v47 = vsel %vm247_vm15, %v237_v46, -inf }
 0x2cd   :  { %249 = vmax.xlane.f32.xlu1 %v248_v47 }
 0x2d1   :  { %370 = vrot.lane.b32.xlu0 %v1635_v37, %s1510_s21 }
 0x2dd   :  { %1387 = vrot.lane.b32.xlu2 %v1653_v48, %s1511_s22 }
 0x2e6   :  { %318 = vrot.lane.b32.xlu1 %v1635_v37, %s1511_s22 }
 0x2ee   :  { %368 = vrot.lane.b32.xlu1 %v186_v36, %s1510_s21 }
 0x2f6   :  { %362 = vrot.lane.b32.xlu1 %v186_v36, %s1512_s23 }
 0x330   :  { %v243_v49 = vpop.xlane.xlu0 %242 }
 0x331   :  { %v251_v50 = vsub.f32 %v231_v42, %v243_v49 }
 0x333   :  { %v254_v51 = vmul.f32 1.442695, %v251_v50 }
 0x335   :  { %1426 = vpow2.f32 %v254_v51 }
 0x338   :  { %v246_v52 = vpop.xlane.xlu2 %245 }
 0x339   :  { %v252_v53 = vsub.f32 %v234_v44, %v246_v52 }
 0x33b   :  { %v1427_v54 = vpop.eup %1426  ;;  %v256_v55 = vmul.f32 1.442695, %v252_v53 }
 0x33c   :  { %v260_v56 = vsel %vm240_vm14, %v1427_v54, 0.0 }
 0x33d   :  { %1428 = vpow2.f32 %v256_v55  ;;  %261 = vadd.xlane.f32.xlu0 %v260_v56 }
 0x340   :  { %v250_v57 = vpop.xlane.xlu1 %249  ;;  %v1388_v0 = vpop.permute.xlu2 %1387 }
 0x341   :  { %v253_v58 = vsub.f32 %v237_v46, %v250_v57  ;;  %v1389_v2 = vunpack.i.l.bf16 %v1388_v0  ;;  %v1390_v3 = vunpack.i.h.bf16 %v1388_v0 }
 0x343   :  { %v1662_v59 = vpop.eup %1428  ;;  %v258_v60 = vmul.f32 1.442695, %v253_v58  ;;  %v371_v4 = vpop.permute.xlu0 %370 }
 0x344   :  { %v263_v61 = vsel %vm240_vm14, %v1662_v59, 0.0 }
 0x345   :  { %1430 = vpow2.f32 %v258_v60  ;;  %264 = vadd.xlane.f32.xlu2 %v263_v61 }
 0x34b   :  { %v1666_v62 = vpop.eup %1430 }
 0x34c   :  { %v266_v63 = vsel %vm247_vm15, %v1666_v62, 0.0 }
 0x34d   :  { %267 = vadd.xlane.f32.xlu0 %v266_v63 }
 0x358   :  { %v319_v1 = vpop.permute.xlu1 %318 }
 0x359   :  { %1334 = vmatpush.msk.msra.mxu3 %vm331_vm3, %v319_v1 }
 0x35b   :  { %348 = vmatpush.msra.mxu3 %v1389_v2 }
 0x35d   :  { %366 = vrot.lane.b32.xlu2 %v1630_v35, %s1510_s21  ;;  %349 = vmatpush.msra.mxu3 %v1390_v3 }
 0x35f   :  { %1338 = vmatpush.xpose.msk.msrb.mxu3 %vm201_vm13, %v371_v4 }
 0x360   :  { %v369_v5 = vpop.permute.xlu1 %368 }
 0x361   :  { %360 = vrot.lane.b32.xlu0 %v1630_v35, %s1512_s23 }
 0x363   :  { %1339 = vmatpush.xpose.msk.msrb.mxu3 %vm201_vm13, %v369_v5 }
 0x365   :  { %364 = vrot.lane.b32.xlu2 %v1635_v37, %s1512_s23 }
 0x368   :  { %v363_v50 = vpop.permute.xlu1 %362 }
 0x3b0   :  { %v262_v6 = vpop.xlane.xlu0 %261 }
 0x3b1   :  { %1432 = vrcp.f32 %v262_v6  ;;  %v280_v11 = vand.u32 2147483648, %v262_v6  ;;  %v278_v14 = vand.u32 2147483647, %v262_v6  ;;  %vm274_vm5 = vweird.f32 %v262_v6 }
 0x3b3   :  { %v281_v17 = vor.u32 1.1754944e-38, %v280_v11  ;;  %vm279_vm7 = vcmp.eq.f32.partialorder %v278_v14, 8.507059e+37 }
 0x3b7   :  { %v1433_v7 = vpop.eup %1432 }
 0x3b8   :  { %v270_v8 = vmul.f32 %v1433_v7, %v262_v6  ;;  %v265_v9 = vpop.xlane.xlu2 %264  ;;  %vm275_vm4 = vweird.f32 %v1433_v7 }
 0x3b9   :  { %1434 = vrcp.f32 %v265_v9  ;;  %vm276_vm6 = vmor %vm274_vm5, %vm275_vm4  ;;  %v295_v27 = vand.u32 2147483648, %v265_v9  ;;  %v293_v29 = vand.u32 2147483647, %v265_v9  ;;  %vm289_vm9 = vweird.f32 %v265_v9 }
 0x3ba   :  { %v271_v10 = vsub.f32 1.0, %v270_v8 }
 0x3bb   :  { %v296_v32 = vor.u32 1.1754944e-38, %v295_v27  ;;  %vm294_vm11 = vcmp.eq.f32.partialorder %v293_v29, 8.507059e+37 }
 0x3bc   :  { %v272_v12 = vmul.f32 %v1433_v7, %v271_v10 }
 0x3be   :  { %v273_v15 = vadd.f32 %v1433_v7, %v272_v12 }
 0x3bf   :  { %v1435_v16 = vpop.eup %1434 }
 0x3c0   :  { %v285_v19 = vmul.f32 %v1435_v16, %v265_v9  ;;  %v367_v20 = vpop.permute.xlu2 %366  ;;  %v268_v21 = vpop.xlane.xlu0 %267  ;;  %v277_v22 = vsel %vm276_vm6, %v1433_v7, %v273_v15  ;;  %vm290_vm8 = vweird.f32 %v1435_v16 }
 0x3c1   :  { %1436 = vrcp.f32 %v268_v21  ;;  %1340 = vmatpush.xpose.msk.msrb.mxu3 %vm201_vm13, %v367_v20  ;;  %v282_v23 = vsel %vm279_vm7, %v281_v17, %v277_v22  ;;  %vm291_vm10 = vmor %vm289_vm9, %vm290_vm8  ;;  %v310_v40 = vand.u32 2147483648, %v268_v21  ;;  %v308_v42 = vand.u32 2147483647, %v268_v21 }
 0x3c2   :  { %v286_v25 = vsub.f32 1.0, %v285_v19  ;;  %v283_v26 = vmul.f32 %v1427_v54, %v282_v23  ;;  %vm304_vm4 = vweird.f32 %v268_v21 }
 0x3c3   :  { %v311_v44 = vor.u32 1.1754944e-38, %v310_v40  ;;  %vm309_vm6 = vcmp.eq.f32.partialorder %v308_v42, 8.507059e+37 }
 0x3c4   :  { %v287_v28 = vmul.f32 %v1435_v16, %v286_v25  ;;  %1335 = vmatmul.msk.f32.vlgmr.msra.gmra.mxu3 %vm240_vm14, %v283_v26 }
 0x3c6   :  { %v288_v30 = vadd.f32 %v1435_v16, %v287_v28 }
 0x3c7   :  { %v1437_v31 = vpop.eup %1436 }
 0x3c8   :  { %v300_v33 = vmul.f32 %v1437_v31, %v268_v21  ;;  %v292_v34 = vsel %vm291_vm10, %v1435_v16, %v288_v30  ;;  %vm305_vm12 = vweird.f32 %v1437_v31  ;;  %v365_v51 = vpop.permute.xlu2 %364 }
 0x3c9   :  { %v297_v35 = vsel %vm294_vm11, %v296_v32, %v292_v34  ;;  %vm306_vm5 = vmor %vm304_vm4, %vm305_vm12 }
 0x3ca   :  { %v301_v36 = vsub.f32 1.0, %v300_v33  ;;  %v298_v39 = vmul.f32 %v1662_v59, %v297_v35 }
 0x3cc   :  { %v302_v41 = vmul.f32 %v1437_v31, %v301_v36  ;;  %1336 = vmatmul.msk.f32.gmra.mxu3 %vm240_vm14, %v298_v39 }
 0x3ce   :  { %v303_v43 = vadd.f32 %v1437_v31, %v302_v41 }
 0x3d0   :  { %v307_v45 = vsel %vm306_vm5, %v1437_v31, %v303_v43 }
 0x3d1   :  { %v312_v46 = vsel %vm309_vm6, %v311_v44, %v307_v45 }
 0x3d2   :  { %v313_v47 = vmul.f32 %v1666_v62, %v312_v46 }
 0x3d3   :  { %v361_v49 = vpop.permute.xlu0 %360 }
 0x3d4   :  { %1337 = vmatmul.msk.f32.gmra.mxu3 %vm240_vm14, %v313_v47 }
 0x3dc   :  { %1341 = vmatmul.msk.f32.vlgmr.msrb.gmra.mxu3 %vm201_vm13, %v361_v49 }
 0x3e4   :  { %1342 = vmatmul.msk.f32.gmra.mxu3 %vm201_vm13, %v363_v50 }
 0x3ec   :  { %1343 = vmatmul.msk.f32.gmra.mxu3 %vm201_vm13, %v365_v51 }
 0x447   :  { %v1688_v52 = vpop.f32.mrf.mxu3 }
 0x44f   :  { %v1690_v53 = vpop.f32.mrf.mxu3 }
 0x457   :  { %v1692_v54 = vpop.f32.mrf.mxu3 }
 0x45f   :  { %v401_v55 = vpop.f32.mrf.mxu3 }
 0x460   :  { %v410_v56 = vsel %vm240_vm14, %v401_v55, -inf }
 0x461   :  { %411 = vmax.xlane.f32.xlu0 %v410_v56 }
 0x467   :  { %v404_v57 = vpop.f32.mrf.mxu3 }
 0x468   :  { %v413_v58 = vsel %vm240_vm14, %v404_v57, -inf }
 0x469   :  { %414 = vmax.xlane.f32.xlu1 %v413_v58 }
 0x46f   :  { %v407_v59 = vpop.f32.mrf.mxu3 }
 0x470   :  { %v416_v60 = vsel %vm247_vm15, %v407_v59, -inf }
 0x471   :  { %417 = vmax.xlane.f32.xlu2 %v416_v60 }
 0x489   :  { %486 = vrot.lane.b32.xlu2 %v1635_v37, %s1513_s24 }
 0x4d4   :  { %v412_v61 = vpop.xlane.xlu0 %411 }
 0x4d5   :  { %v419_v62 = vsub.f32 %v401_v55, %v412_v61 }
 0x4d7   :  { %v422_v63 = vmul.f32 1.442695, %v419_v62  ;;  %v545_v62 = vld [vmem:[%s2010_s1 + $0x90] sm:$0xff] }
 0x4d8   :  { %569 = vmatpush.msrb.mxu2 %v545_v62  ;;  %v1412_v62 = vld [vmem:[%s2010_s1 + $0xfb] ss:$0 sm:$0xff] }
 0x4d9   :  { %1438 = vpow2.f32 %v422_v63  ;;  %v544_v63 = vld [vmem:[%s2010_s1 + $0x88] sm:$0xff] }
 0x4da   :  { %570 = vmatpush.msrb.mxu2 %v544_v63 }
 0x4dc   :  { %v415_v0 = vpop.xlane.xlu1 %414 }
 0x4dd   :  { %v420_v1 = vsub.f32 %v404_v57, %v415_v0  ;;  %v543_v0 = vld [vmem:[%s2010_s1 + $0x80] sm:$0xff] }
 0x4de   :  { %571 = vmatpush.msrb.mxu2 %v543_v0 }
 0x4df   :  { %v1439_v2 = vpop.eup %1438  ;;  %v424_v3 = vmul.f32 1.442695, %v420_v1  ;;  %v542_v1 = vld [vmem:[%s2010_s1 + $0x78] sm:$0xff] }
 0x4e0   :  { %v428_v4 = vsel %vm240_vm14, %v1439_v2, 0.0  ;;  %572 = vmatpush.msrb.mxu2 %v542_v1 }
 0x4e1   :  { %1440 = vpow2.f32 %v424_v3  ;;  %429 = vadd.xlane.f32.xlu0 %v428_v4 }
 0x4e4   :  { %v418_v5 = vpop.xlane.xlu2 %417 }
 0x4e5   :  { %v421_v6 = vsub.f32 %v407_v59, %v418_v5 }
 0x4e7   :  { %v1441_v7 = vpop.eup %1440  ;;  %v426_v8 = vmul.f32 1.442695, %v421_v6 }
 0x4e8   :  { %v431_v9 = vsel %vm240_vm14, %v1441_v7, 0.0 }
 0x4e9   :  { %1442 = vpow2.f32 %v426_v8  ;;  %432 = vadd.xlane.f32.xlu1 %v431_v9  ;;  %v1411_v8 = vld [vmem:[%s2010_s1 + $0xfa] ss:$0 sm:$0xff] }
 0x4ec   :  { %v487_v37 = vpop.permute.xlu2 %486 }
 0x4ed   :  { %1344 = vmatpush.msk.msrb.mxu1 %vm331_vm3, %v487_v37 }
 0x4ef   :  { %v1443_v10 = vpop.eup %1442 }
 0x4f0   :  { %v434_v11 = vsel %vm247_vm15, %v1443_v10, 0.0 }
 0x4f1   :  { %435 = vadd.xlane.f32.xlu0 %v434_v11 }
 0x502   :  { %1392 = vrot.lane.b32.xlu1 %v1653_v48, %s1513_s24 }
 0x554   :  { %v430_v12 = vpop.xlane.xlu0 %429 }
 0x555   :  { %1444 = vrcp.f32 %v430_v12  ;;  %v448_v27 = vand.u32 2147483648, %v430_v12  ;;  %vm442_vm8 = vweird.f32 %v430_v12  ;;  %v446_v28 = vand.u32 2147483647, %v430_v12 }
 0x557   :  { %v449_v31 = vor.u32 1.1754944e-38, %v448_v27  ;;  %vm447_vm10 = vcmp.eq.f32.partialorder %v446_v28, 8.507059e+37  ;;  %v668_v27 = vld [vmem:[%s2010_s1 + $0x98] sm:$0xff] }
 0x55b   :  { %v1445_v15 = vpop.eup %1444 }
 0x55c   :  { %v433_v14 = vpop.xlane.xlu1 %432  ;;  %v438_v16 = vmul.f32 %v1445_v15, %v430_v12  ;;  %vm443_vm7 = vweird.f32 %v1445_v15 }
 0x55d   :  { %1446 = vrcp.f32 %v433_v14  ;;  %vm444_vm9 = vmor %vm442_vm8, %vm443_vm7  ;;  %v463_v39 = vand.u32 2147483648, %v433_v14  ;;  %vm457_vm12 = vweird.f32 %v433_v14  ;;  %v461_v42 = vand.u32 2147483647, %v433_v14 }
 0x55e   :  { %v439_v17 = vsub.f32 1.0, %v438_v16 }
 0x55f   :  { %v464_v45 = vor.u32 1.1754944e-38, %v463_v39  ;;  %vm462_vm5 = vcmp.eq.f32.partialorder %v461_v42, 8.507059e+37 }
 0x560   :  { %v440_v21 = vmul.f32 %v1445_v15, %v439_v17 }
 0x562   :  { %v441_v23 = vadd.f32 %v1445_v15, %v440_v21 }
 0x563   :  { %v1447_v20 = vpop.eup %1446 }
 0x564   :  { %v436_v19 = vpop.xlane.xlu0 %435  ;;  %v453_v22 = vmul.f32 %v1447_v20, %v433_v14  ;;  %v445_v30 = vsel %vm444_vm9, %v1445_v15, %v441_v23  ;;  %vm458_vm11 = vweird.f32 %v1447_v20  ;;  %v671_v23 = vld [vmem:[%s2010_s1 + $0xb0] sm:$0xff] }
 0x565   :  { %1448 = vrcp.f32 %v436_v19  ;;  %v450_v34 = vsel %vm447_vm10, %v449_v31, %v445_v30  ;;  %vm459_vm4 = vmor %vm457_vm12, %vm458_vm11  ;;  %v478_v49 = vand.u32 2147483648, %v436_v19  ;;  %vm472_vm7 = vweird.f32 %v436_v19  ;;  %695 = vmatpush.msrb.mxu0 %v671_v23  ;;  %v743_v23 = vld [vmem:[%s2010_s1 + $0xf0] sm:$0xff] }
 0x566   :  { %v454_v25 = vsub.f32 1.0, %v453_v22  ;;  %v451_v41 = vmul.f32 %v1439_v2, %v450_v34  ;;  %v476_v51 = vand.u32 2147483647, %v436_v19  ;;  %763 = vmatpush.msra.mxu3 %v743_v23  ;;  %v867_v23 = vld [vmem:[%s2010_s1 + $0x108] sm:$0xff] }
 0x567   :  { %v479_v56 = vor.u32 1.1754944e-38, %v478_v49 }
 0x568   :  { %v455_v48 = vmul.f32 %v1447_v20, %v454_v25  ;;  %vm477_vm9 = vcmp.eq.f32.partialorder %v476_v51, 8.507059e+37  ;;  %v669_v25 = vld [vmem:[%s2010_s1 + $0xa0] sm:$0xff] }
 0x56a   :  { %v456_v36 = vadd.f32 %v1447_v20, %v455_v48 }
 0x56b   :  { %v1449_v26 = vpop.eup %1448 }
 0x56c   :  { %v468_v29 = vmul.f32 %v1449_v26, %v436_v19  ;;  %v460_v44 = vsel %vm459_vm4, %v1447_v20, %v456_v36  ;;  %vm473_vm6 = vweird.f32 %v1449_v26 }
 0x56d   :  { %v465_v46 = vsel %vm462_vm5, %v464_v45, %v460_v44  ;;  %vm474_vm8 = vmor %vm472_vm7, %vm473_vm6 }
 0x56e   :  { %v469_v35 = vsub.f32 1.0, %v468_v29  ;;  %v466_v50 = vmul.f32 %v1441_v7, %v465_v46 }
 0x570   :  { %v470_v43 = vmul.f32 %v1449_v26, %v469_v35 }
 0x572   :  { %v471_v47 = vadd.f32 %v1449_v26, %v470_v43 }
 0x574   :  { %v1393_v32 = vpop.permute.xlu1 %1392  ;;  %v475_v55 = vsel %vm474_vm8, %v1449_v26, %v471_v47 }
 0x575   :  { %v1394_v33 = vunpack.i.l.bf16 %v1393_v32  ;;  %v1395_v40 = vunpack.i.h.bf16 %v1393_v32  ;;  %v480_v57 = vsel %vm477_vm9, %v479_v56, %v475_v55 }
 0x576   :  { %v481_v58 = vmul.f32 %v1443_v10, %v480_v57 }
 0x577   :  { %515 = vmatpush.msrb.mxu1 %v1394_v33 }
 0x579   :  { %516 = vmatpush.msrb.mxu1 %v1395_v40 }
 0x57a   :  { %1345 = vmatmul.msk.f32.vlgmr.msrb.gmra.mxu1 %vm240_vm14, %v451_v41 }
 0x582   :  { %1346 = vmatmul.msk.f32.gmra.mxu1 %vm240_vm14, %v466_v50 }
 0x58a   :  { %1347 = vmatmul.msk.f32.gmra.mxu1 %vm240_vm14, %v481_v58 }
 0x5f7   :  { %v518_v59 = vpop.f32.mrf.mxu1 }
 0x5f8   :  { %530 = vrot.lane.b32.xlu0 %v518_v59, %s1514_s25 }
 0x5ff   :  { %v521_v60 = vpop.f32.mrf.mxu1 }
 0x600   :  { %532 = vrot.lane.b32.xlu2 %v521_v60, %s1514_s25 }
 0x607   :  { %v524_v61 = vpop.f32.mrf.mxu1 }
 0x608   :  { %534 = vrot.lane.b32.xlu1 %v524_v61, %s1514_s25 }
 0x65a   :  { %v533_v4 = vpop.permute.xlu2 %532 }
 0x65b   :  { %v540_v5 = vsel %vm201_vm13, %v1690_v53, %v533_v4 }
 0x66a   :  { %v531_v2 = vpop.permute.xlu0 %530 }
 0x66b   :  { %v539_v3 = vsel %vm201_vm13, %v1688_v52, %v531_v2  ;;  %v1413_v2 = vld [vmem:[%s2010_s1 + $0xfc] ss:$0 sm:$0xff] }
 0x66c   :  { %1348 = vmatmul.msk.f32.vlgmr.msrb.gmra.mxu2 %vm64_vm1, %v539_v3 }
 0x674   :  { %1349 = vmatmul.msk.f32.gmra.mxu2 %vm64_vm1, %v540_v5 }
 0x67a   :  { %v535_v6 = vpop.permute.xlu1 %534 }
 0x67b   :  { %v541_v7 = vsel %vm201_vm13, %v1692_v54, %v535_v6 }
 0x67c   :  { %1350 = vmatmul.msk.f32.gmra.mxu2 %vm64_vm1, %v541_v7 }
 0x6ef   :  { %v574_v9 = vpop.f32.mrf.mxu2 }
 0x6f0   :  { %v575_v52 = vadd.f32 %v1411_v8, %v574_v9 }
 0x6f2   :  { %v1736_v37 = vadd.f32 %v575_v52, %v1571_v13 }
 0x6f4   :  { %v588_v53 = vsel %vm64_vm1, %v1736_v37, 0.0  ;;  %v600_v10 = vmul.f32 %v1736_v37, %v1736_v37 }
 0x6f5   :  { %589 = vadd.xlane.f32.xlu0 %v588_v53 }
 0x6f6   :  { %v603_v54 = vsel %vm64_vm1, %v600_v10, 0.0 }
 0x6f7   :  { %604 = vadd.xlane.f32.xlu2 %v603_v54  ;;  %v577_v11 = vpop.f32.mrf.mxu2 }
 0x6f8   :  { %v578_v12 = vadd.f32 %v1411_v8, %v577_v11 }
 0x6fa   :  { %v1744_v14 = vadd.f32 %v578_v12, %v1580_v18 }
 0x6fc   :  { %v591_v15 = vsel %vm64_vm1, %v1744_v14, 0.0  ;;  %v601_v13 = vmul.f32 %v1744_v14, %v1744_v14 }
 0x6fd   :  { %592 = vadd.xlane.f32.xlu1 %v591_v15 }
 0x6fe   :  { %v606_v16 = vsel %vm64_vm1, %v601_v13, 0.0 }
 0x6ff   :  { %607 = vadd.xlane.f32.xlu0 %v606_v16  ;;  %v580_v17 = vpop.f32.mrf.mxu2 }
 0x700   :  { %v581_v19 = vadd.f32 %v1411_v8, %v580_v17 }
 0x702   :  { %v1752_v20 = vadd.f32 %v581_v19, %v1590_v24  ;;  %v670_v24 = vld [vmem:[%s2010_s1 + $0xa8] sm:$0xff] }
 0x703   :  { %696 = vmatpush.msrb.mxu0 %v670_v24  ;;  %v742_v24 = vld [vmem:[%s2010_s1 + $0xe8] sm:$0xff] }
 0x704   :  { %v594_v21 = vsel %vm71_vm2, %v1752_v20, 0.0  ;;  %v602_v18 = vmul.f32 %v1752_v20, %v1752_v20  ;;  %764 = vmatpush.msra.mxu3 %v742_v24 }
 0x705   :  { %595 = vadd.xlane.f32.xlu2 %v594_v21  ;;  %697 = vmatpush.msrb.mxu0 %v669_v25  ;;  %v741_v25 = vld [vmem:[%s2010_s1 + $0xe0] sm:$0xff] }
 0x706   :  { %v609_v22 = vsel %vm71_vm2, %v602_v18, 0.0  ;;  %765 = vmatpush.msra.mxu3 %v741_v25  ;;  %v866_v25 = vld [vmem:[%s2010_s1 + $0x100] sm:$0xff] }
 0x707   :  { %610 = vadd.xlane.f32.xlu1 %v609_v22  ;;  %698 = vmatpush.msrb.mxu0 %v668_v27  ;;  %v739_v27 = vld [vmem:[%s2010_s1 + $0xd0] sm:$0xff] }
 0x768   :  { %v590_v26 = vpop.xlane.xlu0 %589 }
 0x769   :  { %v597_v28 = vmul.f32 %v590_v26, %v1604_v38  ;;  %v740_v26 = vld [vmem:[%s2010_s1 + $0xd8] sm:$0xff] }
 0x76a   :  { %v605_v48 = vpop.xlane.xlu2 %604  ;;  %766 = vmatpush.msra.mxu3 %v740_v26 }
 0x76b   :  { %v615_v29 = vmul.f32 %v597_v28, %v597_v28  ;;  %v612_v30 = vmul.f32 %v605_v48, %v1604_v38  ;;  %v621_v61 = vsub.f32 %v1736_v37, %v597_v28  ;;  %v738_v28 = vld [vmem:[%s2010_s1 + $0xc8] sm:$0xff]  ;;  %v737_v48 = vld [vmem:[%s2010_s1 + $0xc0] sm:$0xff] }
 0x76c   :  { %767 = vmatpush.msra.mxu3 %v739_v27 }
 0x76d   :  { %v618_v31 = vsub.f32 %v612_v30, %v615_v29  ;;  %v736_v29 = vld [vmem:[%s2010_s1 + $0xb8] sm:$0xff] }
 0x76e   :  { %768 = vmatpush.msra.mxu3 %v738_v28  ;;  %v1414_v30 = vld [vmem:[%s2010_s1 + $0xfe] ss:$0 sm:$0xff] }
 0x76f   :  { %v624_v32 = vadd.f32 1e-05, %v618_v31 }
 0x770   :  { %v593_v33 = vpop.xlane.xlu1 %592  ;;  %769 = vmatpush.msra.mxu3 %v737_v48 }
 0x771   :  { %1450 = vrsqrt.f32 %v624_v32  ;;  %v598_v34 = vmul.f32 %v593_v33, %v1604_v38  ;;  %vm633_vm11 = vweird.f32 %v624_v32 }
 0x772   :  { %v608_v35 = vpop.xlane.xlu0 %607  ;;  %770 = vmatpush.msra.mxu3 %v736_v29 }
 0x773   :  { %v616_v36 = vmul.f32 %v598_v34, %v598_v34  ;;  %v613_v39 = vmul.f32 %v608_v35, %v1604_v38  ;;  %v622_v52 = vsub.f32 %v1744_v14, %v598_v34 }
 0x775   :  { %v619_v40 = vsub.f32 %v613_v39, %v616_v36 }
 0x777   :  { %v1451_v41 = vpop.eup %1450  ;;  %v625_v42 = vadd.f32 1e-05, %v619_v40 }
 0x778   :  { %v628_v43 = vmul.f32 %v1451_v41, %v624_v32  ;;  %v596_v44 = vpop.xlane.xlu2 %595  ;;  %vm634_vm10 = vweird.f32 %v1451_v41 }
 0x779   :  { %1452 = vrsqrt.f32 %v625_v42  ;;  %v599_v45 = vmul.f32 %v596_v44, %v1604_v38  ;;  %vm635_vm12 = vmor %vm633_vm11, %vm634_vm10  ;;  %vm643_vm5 = vweird.f32 %v625_v42 }
 0x77a   :  { %v629_v46 = vmul.f32 %v1451_v41, %v628_v43  ;;  %v611_v47 = vpop.xlane.xlu1 %610 }
 0x77b   :  { %v617_v49 = vmul.f32 %v599_v45, %v599_v45  ;;  %v614_v50 = vmul.f32 %v611_v47, %v1604_v38  ;;  %v623_v17 = vsub.f32 %v1752_v20, %v599_v45 }
 0x77c   :  { %v630_v51 = vmul.f32 0.5, %v629_v46 }
 0x77d   :  { %v620_v55 = vsub.f32 %v614_v50, %v617_v49 }
 0x77e   :  { %v631_v56 = vsub.f32 1.5, %v630_v51 }
 0x77f   :  { %v1453_v57 = vpop.eup %1452  ;;  %v626_v58 = vadd.f32 1e-05, %v620_v55 }
 0x780   :  { %v632_v59 = vmul.f32 %v1451_v41, %v631_v56  ;;  %v638_v60 = vmul.f32 %v1453_v57, %v625_v42  ;;  %vm644_vm4 = vweird.f32 %v1453_v57 }
 0x781   :  { %1454 = vrsqrt.f32 %v626_v58  ;;  %vm645_vm6 = vmor %vm643_vm5, %vm644_vm4  ;;  %vm653_vm8 = vweird.f32 %v626_v58 }
 0x782   :  { %v636_v63 = vsel %vm635_vm12, %v1451_v41, %v632_v59  ;;  %v639_v0 = vmul.f32 %v1453_v57, %v638_v60 }
 0x783   :  { %v657_v1 = vmul.f32 %v636_v63, %v621_v61 }
 0x784   :  { %v640_v3 = vmul.f32 0.5, %v639_v0 }
 0x785   :  { %v661_v4 = vmul.f32 %v1412_v62, %v657_v1 }
 0x786   :  { %v641_v5 = vsub.f32 1.5, %v640_v3 }
 0x787   :  { %v1455_v6 = vpop.eup %1454  ;;  %v665_v7 = vadd.f32 %v1413_v2, %v661_v4 }
 0x788   :  { %v642_v8 = vmul.f32 %v1453_v57, %v641_v5  ;;  %v648_v9 = vmul.f32 %v1455_v6, %v626_v58  ;;  %vm654_vm7 = vweird.f32 %v1455_v6 }
 0x789   :  { %1351 = vmatmul.msk.f32.vlgmr.msrb.gmra.mxu0 %vm64_vm1, %v665_v7  ;;  %vm655_vm9 = vmor %vm653_vm8, %vm654_vm7 }
 0x78a   :  { %v649_v53 = vmul.f32 %v1455_v6, %v648_v9  ;;  %v646_v10 = vsel %vm645_vm6, %v1453_v57, %v642_v8 }
 0x78b   :  { %v658_v54 = vmul.f32 %v646_v10, %v622_v52 }
 0x78c   :  { %v650_v11 = vmul.f32 0.5, %v649_v53 }
 0x78d   :  { %v662_v12 = vmul.f32 %v1412_v62, %v658_v54 }
 0x78e   :  { %v651_v15 = vsub.f32 1.5, %v650_v11 }
 0x78f   :  { %v666_v13 = vadd.f32 %v1413_v2, %v662_v12 }
 0x790   :  { %v652_v16 = vmul.f32 %v1455_v6, %v651_v15 }
 0x791   :  { %1352 = vmatmul.msk.f32.gmra.mxu0 %vm64_vm1, %v666_v13 }
 0x792   :  { %v656_v19 = vsel %vm655_vm9, %v1455_v6, %v652_v16  ;;  %v1415_v6 = vld [vmem:[%s2010_s1 + $0xfd] ss:$0 sm:$0xff] }
 0x793   :  { %v659_v21 = vmul.f32 %v656_v19, %v623_v17 }
 0x795   :  { %v663_v18 = vmul.f32 %v1412_v62, %v659_v21 }
 0x797   :  { %v667_v22 = vadd.f32 %v1413_v2, %v663_v18 }
 0x799   :  { %1353 = vmatmul.msk.f32.gmra.mxu0 %vm64_vm1, %v667_v22  ;;  %v869_v22 = vld [vmem:[%s2010_s1 + $0x118] sm:$0xff] }
 0x79a   :  { %891 = vmatpush.msra.mxu1 %v869_v22 }
 0x806   :  { %v700_v31 = vpop.f32.mrf.mxu0 }
 0x807   :  { %v701_v32 = vadd.f32 %v1414_v30, %v700_v31 }
 0x809   :  { %v712_v33 = vmul.f32 0.044715, %v701_v32  ;;  %v709_v55 = vmul.f32 0.5, %v701_v32 }
 0x80b   :  { %v715_v34 = vmul.f32 %v712_v33, %v701_v32 }
 0x80d   :  { %v718_v35 = vmul.f32 %v715_v34, %v701_v32 }
 0x80e   :  { %v703_v36 = vpop.f32.mrf.mxu0 }
 0x80f   :  { %v721_v39 = vadd.f32 %v718_v35, %v701_v32  ;;  %v704_v40 = vadd.f32 %v1414_v30, %v703_v36 }
 0x811   :  { %v724_v41 = vmul.f32 0.7978846, %v721_v39  ;;  %v713_v42 = vmul.f32 0.044715, %v704_v40  ;;  %v710_v63 = vmul.f32 0.5, %v704_v40 }
 0x813   :  { %1456 = vtanh.f32 %v724_v41  ;;  %v716_v43 = vmul.f32 %v713_v42, %v704_v40 }
 0x815   :  { %v719_v44 = vmul.f32 %v716_v43, %v704_v40 }
 0x816   :  { %v706_v45 = vpop.f32.mrf.mxu0 }
 0x817   :  { %v707_v46 = vadd.f32 %v1414_v30, %v706_v45  ;;  %v722_v47 = vadd.f32 %v719_v44, %v704_v40 }
 0x819   :  { %v1457_v49 = vpop.eup %1456  ;;  %v714_v50 = vmul.f32 0.044715, %v707_v46  ;;  %v725_v51 = vmul.f32 0.7978846, %v722_v47  ;;  %v711_v3 = vmul.f32 0.5, %v707_v46 }
 0x81a   :  { %v730_v56 = vadd.f32 1.0, %v1457_v49 }
 0x81b   :  { %1458 = vtanh.f32 %v725_v51  ;;  %v717_v57 = vmul.f32 %v714_v50, %v707_v46 }
 0x81c   :  { %v733_v58 = vmul.f32 %v730_v56, %v709_v55 }
 0x81d   :  { %v720_v59 = vmul.f32 %v717_v57, %v707_v46 }
 0x81e   :  { %1354 = vmatmul.msk.f32.vlgmr.msra.gmra.mxu3 %vm26_vm0, %v733_v58 }
 0x81f   :  { %v723_v60 = vadd.f32 %v720_v59, %v707_v46 }
 0x821   :  { %v1459_v61 = vpop.eup %1458  ;;  %v726_v62 = vmul.f32 0.7978846, %v723_v60  ;;  %v1416_v60 = vld [vmem:[%s2010_s1 + $0x1a0] ss:$0 sm:$0xff] }
 0x822   :  { %v731_v0 = vadd.f32 1.0, %v1459_v61 }
 0x823   :  { %1460 = vtanh.f32 %v726_v62 }
 0x824   :  { %v734_v1 = vmul.f32 %v731_v0, %v710_v63  ;;  %v1417_v0 = vld [vmem:[%s2010_s1 + $0x1a1] ss:$0 sm:$0xff] }
 0x826   :  { %1355 = vmatmul.msk.f32.gmra.mxu3 %vm26_vm0, %v734_v1 }
 0x829   :  { %v1461_v2 = vpop.eup %1460 }
 0x82a   :  { %v732_v4 = vadd.f32 1.0, %v1461_v2 }
 0x82c   :  { %v735_v5 = vmul.f32 %v732_v4, %v711_v3 }
 0x82e   :  { %1356 = vmatmul.msk.f32.gmra.mxu3 %vm26_vm0, %v735_v5 }
 0x8a1   :  { %v772_v7 = vpop.f32.mrf.mxu3 }
 0x8a2   :  { %v773_v8 = vadd.f32 %v1415_v6, %v772_v7 }
 0x8a4   :  { %v1823_v9 = vadd.f32 %v773_v8, %v1736_v37 }
 0x8a6   :  { %v786_v52 = vsel %vm64_vm1, %v1823_v9, 0.0  ;;  %v798_v53 = vmul.f32 %v1823_v9, %v1823_v9 }
 0x8a7   :  { %787 = vadd.xlane.f32.xlu0 %v786_v52 }
 0x8a8   :  { %v801_v10 = vsel %vm64_vm1, %v798_v53, 0.0 }
 0x8a9   :  { %802 = vadd.xlane.f32.xlu2 %v801_v10  ;;  %v775_v54 = vpop.f32.mrf.mxu3 }
 0x8aa   :  { %v776_v11 = vadd.f32 %v1415_v6, %v775_v54 }
 0x8ac   :  { %v1831_v12 = vadd.f32 %v776_v11, %v1744_v14 }
 0x8ae   :  { %v789_v15 = vsel %vm64_vm1, %v1831_v12, 0.0  ;;  %v799_v37 = vmul.f32 %v1831_v12, %v1831_v12 }
 0x8af   :  { %790 = vadd.xlane.f32.xlu1 %v789_v15 }
 0x8b0   :  { %v804_v13 = vsel %vm64_vm1, %v799_v37, 0.0 }
 0x8b1   :  { %805 = vadd.xlane.f32.xlu0 %v804_v13  ;;  %v778_v16 = vpop.f32.mrf.mxu3 }
 0x8b2   :  { %v779_v17 = vadd.f32 %v1415_v6, %v778_v16 }
 0x8b4   :  { %v1839_v19 = vadd.f32 %v779_v17, %v1752_v20  ;;  %v868_v20 = vld [vmem:[%s2010_s1 + $0x110] sm:$0xff] }
 0x8b5   :  { %892 = vmatpush.msra.mxu1 %v868_v20 }
 0x8b6   :  { %v792_v21 = vsel %vm71_vm2, %v1839_v19, 0.0  ;;  %v800_v14 = vmul.f32 %v1839_v19, %v1839_v19 }
 0x8b7   :  { %793 = vadd.xlane.f32.xlu2 %v792_v21  ;;  %893 = vmatpush.msra.mxu1 %v867_v23 }
 0x8b8   :  { %v807_v18 = vsel %vm71_vm2, %v800_v14, 0.0 }
 0x8b9   :  { %808 = vadd.xlane.f32.xlu1 %v807_v18  ;;  %894 = vmatpush.msra.mxu1 %v866_v25 }
 0x91a   :  { %v788_v24 = vpop.xlane.xlu0 %787 }
 0x91b   :  { %v795_v26 = vmul.f32 %v788_v24, %v1604_v38 }
 0x91c   :  { %v803_v27 = vpop.xlane.xlu2 %802 }
 0x91d   :  { %v813_v28 = vmul.f32 %v795_v26, %v795_v26  ;;  %v810_v48 = vmul.f32 %v803_v27, %v1604_v38  ;;  %v819_v59 = vsub.f32 %v1823_v9, %v795_v26 }
 0x91f   :  { %v816_v29 = vsub.f32 %v810_v48, %v813_v28 }
 0x921   :  { %v822_v30 = vadd.f32 1e-05, %v816_v29 }
 0x922   :  { %v791_v31 = vpop.xlane.xlu1 %790 }
 0x923   :  { %1462 = vrsqrt.f32 %v822_v30  ;;  %v796_v32 = vmul.f32 %v791_v31, %v1604_v38  ;;  %vm831_vm11 = vweird.f32 %v822_v30 }
 0x924   :  { %v806_v33 = vpop.xlane.xlu0 %805 }
 0x925   :  { %v814_v34 = vmul.f32 %v796_v32, %v796_v32  ;;  %v811_v35 = vmul.f32 %v806_v33, %v1604_v38  ;;  %v820_v8 = vsub.f32 %v1831_v12, %v796_v32 }
 0x927   :  { %v817_v36 = vsub.f32 %v811_v35, %v814_v34 }
 0x929   :  { %v1463_v39 = vpop.eup %1462  ;;  %v823_v40 = vadd.f32 1e-05, %v817_v36 }
 0x92a   :  { %v826_v41 = vmul.f32 %v1463_v39, %v822_v30  ;;  %v794_v42 = vpop.xlane.xlu2 %793  ;;  %vm832_vm10 = vweird.f32 %v1463_v39 }
 0x92b   :  { %1464 = vrsqrt.f32 %v823_v40  ;;  %v797_v43 = vmul.f32 %v794_v42, %v1604_v38  ;;  %vm833_vm12 = vmor %vm831_vm11, %vm832_vm10  ;;  %vm841_vm5 = vweird.f32 %v823_v40 }
 0x92c   :  { %v827_v44 = vmul.f32 %v1463_v39, %v826_v41  ;;  %v809_v45 = vpop.xlane.xlu1 %808 }
 0x92d   :  { %v815_v46 = vmul.f32 %v797_v43, %v797_v43  ;;  %v812_v47 = vmul.f32 %v809_v45, %v1604_v38  ;;  %v821_v16 = vsub.f32 %v1839_v19, %v797_v43 }
 0x92e   :  { %v828_v49 = vmul.f32 0.5, %v827_v44 }
 0x92f   :  { %v818_v50 = vsub.f32 %v812_v47, %v815_v46 }
 0x930   :  { %v829_v51 = vsub.f32 1.5, %v828_v49 }
 0x931   :  { %v1465_v55 = vpop.eup %1464  ;;  %v824_v56 = vadd.f32 1e-05, %v818_v50 }
 0x932   :  { %v830_v57 = vmul.f32 %v1463_v39, %v829_v51  ;;  %v836_v58 = vmul.f32 %v1465_v55, %v823_v40  ;;  %vm842_vm4 = vweird.f32 %v1465_v55 }
 0x933   :  { %1466 = vrsqrt.f32 %v824_v56  ;;  %vm843_vm6 = vmor %vm841_vm5, %vm842_vm4  ;;  %vm851_vm8 = vweird.f32 %v824_v56 }
 0x934   :  { %v834_v61 = vsel %vm833_vm12, %v1463_v39, %v830_v57  ;;  %v837_v62 = vmul.f32 %v1465_v55, %v836_v58 }
 0x935   :  { %v855_v63 = vmul.f32 %v834_v61, %v819_v59 }
 0x936   :  { %v838_v1 = vmul.f32 0.5, %v837_v62 }
 0x937   :  { %v859_v2 = vmul.f32 %v1416_v60, %v855_v63 }
 0x938   :  { %v839_v3 = vsub.f32 1.5, %v838_v1 }
 0x939   :  { %v1467_v4 = vpop.eup %1466  ;;  %v863_v5 = vadd.f32 %v1417_v0, %v859_v2 }
 0x93a   :  { %v840_v6 = vmul.f32 %v1465_v55, %v839_v3  ;;  %v846_v7 = vmul.f32 %v1467_v4, %v824_v56  ;;  %vm852_vm7 = vweird.f32 %v1467_v4 }
 0x93b   :  { %1357 = vmatmul.msk.f32.vlgmr.msra.gmra.mxu1 %vm64_vm1, %v863_v5  ;;  %vm853_vm9 = vmor %vm851_vm8, %vm852_vm7 }
 0x93c   :  { %v847_v52 = vmul.f32 %v1467_v4, %v846_v7  ;;  %v844_v53 = vsel %vm843_vm6, %v1465_v55, %v840_v6 }
 0x93d   :  { %v856_v10 = vmul.f32 %v844_v53, %v820_v8 }
 0x93e   :  { %v848_v54 = vmul.f32 0.5, %v847_v52 }
 0x93f   :  { %v860_v11 = vmul.f32 %v1416_v60, %v856_v10 }
 0x940   :  { %v849_v15 = vsub.f32 1.5, %v848_v54 }
 0x941   :  { %v864_v37 = vadd.f32 %v1417_v0, %v860_v11 }
 0x942   :  { %v850_v13 = vmul.f32 %v1467_v4, %v849_v15 }
 0x943   :  { %1358 = vmatmul.msk.f32.gmra.mxu1 %vm64_vm1, %v864_v37 }
 0x944   :  { %v854_v17 = vsel %vm853_vm9, %v1467_v4, %v850_v13  ;;  %vm1279_vm9 = vcmask 1043456  }
 0x945   :  { %v857_v12 = vmul.f32 %v854_v17, %v821_v16  ;;  %v1100_v16 = vld [vmem:[%s2010_s1 + $0x138] sm:$0xff]  ;;  %v1099_v17 = vld [vmem:[%s2010_s1 + $0x130] sm:$0xff] }
 0x946   :  { %1117 = vmatpush.msrb.mxu3 %v1100_v16 }
 0x947   :  { %v861_v21 = vmul.f32 %v1416_v60, %v857_v12  ;;  %v1098_v12 = vld [vmem:[%s2010_s1 + $0x128] sm:$0xff] }
 0x948   :  { %1118 = vmatpush.msrb.mxu3 %v1099_v17 }
 0x949   :  { %v865_v14 = vadd.f32 %v1417_v0, %v861_v21 }
 0x94a   :  { %1119 = vmatpush.msrb.mxu3 %v1098_v12 }
 0x94b   :  { %1359 = vmatmul.msk.f32.gmra.mxu1 %vm64_vm1, %v865_v14 }
 0x9b8   :  { %v896_v18 = vpop.f32.mrf.mxu1 }
 0x9b9   :  { %908 = vrot.lane.b32.xlu1 %v896_v18, %s1509_s20 }
 0x9c0   :  { %v899_v22 = vpop.f32.mrf.mxu1 }
 0x9c1   :  { %999 = vrot.lane.b32.xlu1 %v896_v18, %s1512_s23  ;;  %910 = vrot.lane.b32.xlu2 %v899_v22, %s1509_s20  ;;  %v1401_v32 = vpack.i.bf16 %v896_v18, %v899_v22 }
 0x9c8   :  { %v902_v20 = vpop.f32.mrf.mxu1 }
 0x9c9   :  { %1003 = vrot.lane.b32.xlu2 %v899_v22, %s1510_s21  ;;  %912 = vrot.lane.b32.xlu0 %v902_v20, %s1509_s20  ;;  %s1313_s20 = sshll.u32 %s2011_s2, 4  ;;  %s1314_s20 = int_to_ptr.hbm [resolvable:$true] %s1313_s20 }
 0x9d1   :  { %1005 = vrot.lane.b32.xlu0 %v902_v20, %s1510_s21 }
 0x9d9   :  { %1001 = vrot.lane.b32.xlu0 %v896_v18, %s1510_s21 }
 0xa1b   :  { %v911_v23 = vpop.permute.xlu2 %910 }
 0xa23   :  { %v1004_v26 = vpop.permute.xlu2 %1003 }
 0xa2b   :  { %v909_v24 = vpop.permute.xlu1 %908 }
 0xa33   :  { %v1000_v28 = vpop.permute.xlu1 %999 }
 0xa3b   :  { %v913_v19 = vpop.permute.xlu0 %912 }
 0xa3c   :  { %1360 = vmatpush.xpose.msk.msra.mxu2 %vm201_vm13, %v913_v19  ;;  %v1101_v19 = vld [vmem:[%s2010_s1 + $0x1a2] sm:$0x1] }
 0xa40   :  { %1361 = vmatpush.xpose.msk.msra.mxu2 %vm201_vm13, %v911_v23 }
 0xa43   :  { %v1006_v25 = vpop.permute.xlu0 %1005 }
 0xa44   :  { %1362 = vmatpush.xpose.msk.msra.mxu2 %vm201_vm13, %v909_v24 }
 0xa47   :  { %1363 = vmatmul.msk.f32.vlgmr.msra.gmra.mxu2 %vm201_vm13, %v896_v18  ;;  %v1097_v18 = vld [vmem:[%s2010_s1 + $0x120] sm:$0xff] }
 0xa48   :  { %1366 = vmatpush.xpose.msk.msrb.mxu2 %vm201_vm13, %v1006_v25  ;;  %1120 = vmatpush.msrb.mxu3 %v1097_v18  ;;  %v1260_v18 = vld [vmem:[%s2010_s1 + $0x1ad] sm:$0xf] }
 0xa4b   :  { %v1002_v27 = vpop.permute.xlu0 %1001 }
 0xa4c   :  { %1367 = vmatpush.xpose.msk.msrb.mxu2 %vm201_vm13, %v1004_v26 }
 0xa50   :  { %1368 = vmatpush.xpose.msk.msrb.mxu2 %vm201_vm13, %v1002_v27 }
 0xa53   :  { %1369 = vmatmul.msk.f32.vlgmr.msrb.gmra.mxu2 %vm201_vm13, %v1000_v28 }
 0xaca   :  { %v939_v48 = vpop.f32.mrf.mxu2 }
 0xacb   :  { %v942_v29 = vsel %vm247_vm15, %v939_v48, -inf }
 0xacc   :  { %943 = vmax.xlane.f32.xlu2 %v942_v29  ;;  %v1155_v29 = vld [vmem:[%s2010_s1 + $0x148] sm:$0xff] }
 0xad6   :  { %v1032_v30 = vpop.f32.mrf.mxu2 }
 0xad7   :  { %v1035_v31 = vsel %vm247_vm15, %v1032_v30, -inf }
 0xad8   :  { %1036 = vmax.xlane.f32.xlu0 %v1035_v31 }
 0xaec   :  { %970 = vrot.lane.b32.xlu0 %v902_v20, %s1511_s22 }
 0xaf4   :  { %1402 = vrot.lane.b32.xlu0 %v1401_v32, %s1513_s24 }
 0xb3f   :  { %v944_v33 = vpop.xlane.xlu2 %943 }
 0xb40   :  { %v945_v34 = vsub.f32 %v939_v48, %v944_v33  ;;  %v1157_v48 = vld [vmem:[%s2010_s1 + $0x158] sm:$0xff] }
 0xb42   :  { %v946_v35 = vmul.f32 1.442695, %v945_v34 }
 0xb44   :  { %1468 = vpow2.f32 %v946_v35 }
 0xb4a   :  { %v1469_v40 = vpop.eup %1468 }
 0xb4b   :  { %v1037_v36 = vpop.xlane.xlu0 %1036  ;;  %v948_v42 = vsel %vm247_vm15, %v1469_v40, 0.0 }
 0xb4c   :  { %v1038_v39 = vsub.f32 %v1032_v30, %v1037_v36  ;;  %949 = vadd.xlane.f32.xlu1 %v948_v42  ;;  %v1154_v30 = vld [vmem:[%s2010_s1 + $0x140] sm:$0xff] }
 0xb4e   :  { %v1039_v41 = vmul.f32 1.442695, %v1038_v39 }
 0xb50   :  { %1470 = vpow2.f32 %v1039_v41 }
 0xb56   :  { %v1471_v43 = vpop.eup %1470 }
 0xb57   :  { %v1041_v44 = vsel %vm247_vm15, %v1471_v43, 0.0 }
 0xb58   :  { %1042 = vadd.xlane.f32.xlu2 %v1041_v44 }
 0xb5e   :  { %v971_v45 = vpop.permute.xlu0 %970 }
 0xb5f   :  { %1364 = vmatpush.msk.msra.mxu0 %vm331_vm3, %v971_v45 }
 0xb65   :  { %1397 = vrot.lane.b32.xlu1 %v1401_v32, %s1511_s22 }
 0xb66   :  { %v1403_v7 = vpop.permute.xlu0 %1402 }
 0xb67   :  { %v1404_v54 = vunpack.i.l.bf16 %v1403_v7  ;;  %v1405_v15 = vunpack.i.h.bf16 %v1403_v7 }
 0xb70   :  { %1063 = vrot.lane.b32.xlu2 %v902_v20, %s1513_s24 }
 0xbbf   :  { %v950_v46 = vpop.xlane.xlu1 %949 }
 0xbc0   :  { %1472 = vrcp.f32 %v950_v46  ;;  %v962_v59 = vand.u32 2147483648, %v950_v46  ;;  %vm956_vm10 = vweird.f32 %v950_v46  ;;  %v960_v61 = vand.u32 2147483647, %v950_v46 }
 0xbc2   :  { %v963_v0 = vor.u32 1.1754944e-38, %v962_v59  ;;  %vm961_vm12 = vcmp.eq.f32.partialorder %v960_v61, 8.507059e+37  ;;  %v1196_v59 = vld [vmem:[%s2010_s1 + $0x188] sm:$0xff]  ;;  %v1194_v61 = vld [vmem:[%s2010_s1 + $0x178] sm:$0xff] }
 0xbc6   :  { %v1473_v47 = vpop.eup %1472 }
 0xbc7   :  { %v952_v49 = vmul.f32 %v1473_v47, %v950_v46  ;;  %vm957_vm15 = vweird.f32 %v1473_v47 }
 0xbc8   :  { %vm958_vm11 = vmor %vm956_vm10, %vm957_vm15  ;;  %vm1275_vm15 = vcmask 31744  }
 0xbc9   :  { %v953_v51 = vsub.f32 1.0, %v952_v49 }
 0xbcb   :  { %v1043_v50 = vpop.xlane.xlu2 %1042  ;;  %v954_v55 = vmul.f32 %v1473_v47, %v953_v51  ;;  %v1127_v51 = vld [vmem:[%s2010_s1 + $0x1a4] sm:$0x1] }
 0xbcc   :  { %1474 = vrcp.f32 %v1043_v50  ;;  %v1055_v5 = vand.u32 2147483648, %v1043_v50  ;;  %vm1049_vm5 = vweird.f32 %v1043_v50  ;;  %v1053_v8 = vand.u32 2147483647, %v1043_v50 }
 0xbcd   :  { %v955_v58 = vadd.f32 %v1473_v47, %v954_v55 }
 0xbce   :  { %v1056_v11 = vor.u32 1.1754944e-38, %v1055_v5  ;;  %vm1054_vm7 = vcmp.eq.f32.partialorder %v1053_v8, 8.507059e+37 }
 0xbcf   :  { %v959_v62 = vsel %vm958_vm11, %v1473_v47, %v955_v58  ;;  %v1126_v47 = vld [vmem:[%s2010_s1 + $0x1a3] sm:$0x1]  ;;  %v1197_v58 = vld [vmem:[%s2010_s1 + $0x190] sm:$0xff] }
 0xbd0   :  { %v964_v2 = vsel %vm961_vm12, %v963_v0, %v959_v62  ;;  %v1193_v62 = vld [vmem:[%s2010_s1 + $0x170] sm:$0xff]  ;;  %v1191_v0 = vld [vmem:[%s2010_s1 + $0x160] sm:$0xff] }
 0xbd1   :  { %v965_v52 = vmul.f32 %v1469_v40, %v964_v2 }
 0xbd2   :  { %v1475_v56 = vpop.eup %1474 }
 0xbd3   :  { %v1045_v57 = vmul.f32 %v1475_v56, %v1043_v50  ;;  %vm1050_vm4 = vweird.f32 %v1475_v56  ;;  %v1064_v10 = vpop.permute.xlu2 %1063 }
 0xbd4   :  { %vm1051_vm6 = vmor %vm1049_vm5, %vm1050_vm4 }
 0xbd5   :  { %v1046_v60 = vsub.f32 1.0, %v1045_v57  ;;  %v1198_v57 = vld [vmem:[%s2010_s1 + $0x198] sm:$0xff] }
 0xbd6   :  { %1211 = vmatpush.msrb.mxu1 %v1198_v57 }
 0xbd7   :  { %v1047_v63 = vmul.f32 %v1475_v56, %v1046_v60  ;;  %v1398_v1 = vpop.permute.xlu1 %1397  ;;  %v1195_v60 = vld [vmem:[%s2010_s1 + $0x180] sm:$0xff] }
 0xbd8   :  { %v1399_v3 = vunpack.i.l.bf16 %v1398_v1  ;;  %v1400_v6 = vunpack.i.h.bf16 %v1398_v1  ;;  %1212 = vmatpush.msrb.mxu1 %v1197_v58  ;;  %v1158_v1 = vld [vmem:[%s2010_s1 + $0x1a6] sm:$0x1] }
 0xbd9   :  { %v1048_v4 = vadd.f32 %v1475_v56, %v1047_v63  ;;  %v1192_v63 = vld [vmem:[%s2010_s1 + $0x168] sm:$0xff] }
 0xbda   :  { %993 = vmatpush.msra.mxu0 %v1399_v3  ;;  %1213 = vmatpush.msrb.mxu1 %v1196_v59 }
 0xbdb   :  { %v1052_v53 = vsel %vm1051_vm6, %v1475_v56, %v1048_v4 }
 0xbdc   :  { %994 = vmatpush.msra.mxu0 %v1400_v6  ;;  %v1057_v37 = vsel %vm1054_vm7, %v1056_v11, %v1052_v53  ;;  %1214 = vmatpush.msrb.mxu1 %v1195_v60  ;;  %v1252_v11 = vld [vmem:[%s2010_s1 + $0x1a9] sm:$0xf] }
 0xbdd   :  { %1365 = vmatmul.msk.f32.vlgmr.msra.gmra.mxu0 %vm240_vm14, %v965_v52  ;;  %v1058_v13 = vmul.f32 %v1471_v43, %v1057_v37  ;;  %v1199_v37 = vld [vmem:[%s2010_s1 + $0x1a5] sm:$0x1] }
 0xbde   :  { %1370 = vmatpush.msk.msrb.mxu0 %vm331_vm3, %v1064_v10  ;;  %1215 = vmatpush.msrb.mxu1 %v1194_v61 }
 0xbe0   :  { %1086 = vmatpush.msrb.mxu0 %v1404_v54  ;;  %1216 = vmatpush.msrb.mxu1 %v1193_v62 }
 0xbe2   :  { %1087 = vmatpush.msrb.mxu0 %v1405_v15  ;;  %1217 = vmatpush.msrb.mxu1 %v1192_v63  ;;  %v1515_v15 = vmov 0  }
 0xbe3   :  { %1406 = vset.pattern.permute.xlu1 %v1515_v15  ;;  %1407 = vset.pattern.permute.xlu2 %v1515_v15 }
 0xbe4   :  { %1174 = vmatpush.msra.mxu0 %v1157_v48  ;;  %1218 = vmatpush.msrb.mxu1 %v1191_v0 }
 0xbe5   :  { %1371 = vmatmul.msk.f32.vlgmr.msrb.gmra.mxu0 %vm240_vm14, %v1058_v13  ;;  %1408 = vset.pattern.permute.xlu0 %v1515_v15 }
 0xc5a   :  { %v996_v21 = vpop.f32.mrf.mxu0 }
 0xc62   :  { %v1089_v14 = vpop.f32.mrf.mxu0 }
 0xc63   :  { %1093 = vrot.lane.b32.xlu0 %v1089_v14, %s1514_s25 }
 0xcd5   :  { %v1094_v22 = vpop.permute.xlu0 %1093 }
 0xcd6   :  { %v1096_v20 = vsel %vm201_vm13, %v996_v21, %v1094_v22 }
 0xcd7   :  { %1372 = vmatmul.msk.f32.vlgmr.msrb.gmra.mxu3 %vm64_vm1, %v1096_v20 }
 0xd5a   :  { %v1122_v23 = vpop.f32.mrf.mxu3 }
 0xd5b   :  { %v1123_v24 = vadd.f32 %v1122_v23, %v1101_v19 }
 0xd5d   :  { %v1922_v25 = vadd.f32 %v1123_v24, %v1823_v9  ;;  %v1156_v9 = vld [vmem:[%s2010_s1 + $0x150] sm:$0xff] }
 0xd5e   :  { %1175 = vmatpush.msra.mxu0 %v1156_v9 }
 0xd5f   :  { %v1128_v26 = vsel %vm71_vm2, %v1922_v25, 0.0  ;;  %v1132_v27 = vmul.f32 %v1922_v25, %v1922_v25 }
 0xd60   :  { %1129 = vadd.xlane.f32.xlu2 %v1128_v26  ;;  %1176 = vmatpush.msra.mxu0 %v1155_v29 }
 0xd61   :  { %v1133_v28 = vsel %vm71_vm2, %v1132_v27, 0.0  ;;  %v1269_v27 = vld [vmem:[%s2010_s1 + $0x1b1] sm:$0xff] }
 0xd62   :  { %1134 = vadd.xlane.f32.xlu1 %v1133_v28  ;;  %1177 = vmatpush.msra.mxu0 %v1154_v30 }
 0xd7b   :  { %1255 = vperm.xlu1 %1406, %v1252_v11  }
 0xdd3   :  { %v1130_v31 = vpop.xlane.xlu2 %1129 }
 0xdd4   :  { %v1131_v32 = vmul.f32 %v1130_v31, %v1604_v38 }
 0xdd5   :  { %v1135_v33 = vpop.xlane.xlu1 %1134 }
 0xdd6   :  { %v1137_v34 = vmul.f32 %v1131_v32, %v1131_v32  ;;  %v1136_v35 = vmul.f32 %v1135_v33, %v1604_v38  ;;  %v1139_v46 = vsub.f32 %v1922_v25, %v1131_v32 }
 0xdd8   :  { %v1138_v36 = vsub.f32 %v1136_v35, %v1137_v34  ;;  %v1225_v35 = vld [vmem:[%s2010_s1 + $0x1a8] sm:$0x1] }
 0xdda   :  { %v1140_v39 = vadd.f32 1e-05, %v1138_v36 }
 0xddc   :  { %1476 = vrsqrt.f32 %v1140_v39  ;;  %vm1147_vm14 = vweird.f32 %v1140_v39 }
 0xde2   :  { %v1477_v40 = vpop.eup %1476 }
 0xde3   :  { %v1142_v41 = vmul.f32 %v1477_v40, %v1140_v39  ;;  %vm1148_vm13 = vweird.f32 %v1477_v40 }
 0xde4   :  { %vm1149_vm3 = vmor %vm1147_vm14, %vm1148_vm13 }
 0xde5   :  { %v1143_v42 = vmul.f32 %v1477_v40, %v1142_v41 }
 0xde7   :  { %v1144_v43 = vmul.f32 0.5, %v1143_v42 }
 0xde9   :  { %v1145_v44 = vsub.f32 1.5, %v1144_v43 }
 0xdeb   :  { %v1146_v45 = vmul.f32 %v1477_v40, %v1145_v44 }
 0xded   :  { %v1150_v49 = vsel %vm1149_vm3, %v1477_v40, %v1146_v45  ;;  %v1256_v40 = vpop.permute.xlu1 %1255 }
 0xdee   :  { %v1151_v50 = vmul.f32 %v1150_v49, %v1139_v46  ;;  %v1268_v46 = vld [vmem:[%s2010_s1 + $0x1c0] sm:$0xff] }
 0xdf0   :  { %v1152_v55 = vmul.f32 %v1151_v50, %v1126_v47 }
 0xdf2   :  { %v1153_v56 = vadd.f32 %v1152_v55, %v1127_v51 }
 0xdf4   :  { %1373 = vmatmul.msk.f32.vlgmr.msra.gmra.mxu0 %vm64_vm1, %v1153_v56 }
 0xe71   :  { %v1179_v2 = vpop.f32.mrf.mxu0 }
 0xe72   :  { %v1180_v3 = vadd.f32 %v1179_v2, %v1158_v1 }
 0xe74   :  { %v1183_v4 = vmul.f32 0.044715, %v1180_v3  ;;  %v1182_v53 = vmul.f32 0.5, %v1180_v3 }
 0xe76   :  { %v1184_v5 = vmul.f32 %v1183_v4, %v1180_v3 }
 0xe78   :  { %v1185_v6 = vmul.f32 %v1184_v5, %v1180_v3 }
 0xe7a   :  { %v1186_v7 = vadd.f32 %v1185_v6, %v1180_v3 }
 0xe7c   :  { %v1187_v8 = vmul.f32 0.7978846, %v1186_v7 }
 0xe7e   :  { %1478 = vtanh.f32 %v1187_v8 }
 0xe84   :  { %v1479_v52 = vpop.eup %1478 }
 0xe85   :  { %v1189_v10 = vadd.f32 1.0, %v1479_v52 }
 0xe87   :  { %v1190_v54 = vmul.f32 %v1189_v10, %v1182_v53 }
 0xe89   :  { %1374 = vmatmul.msk.f32.vlgmr.msrb.gmra.mxu1 %vm26_vm0, %v1190_v54 }
 0xf06   :  { %v1220_v13 = vpop.f32.mrf.mxu1 }
 0xf07   :  { %v1221_v16 = vadd.f32 %v1220_v13, %v1199_v37 }
 0xf09   :  { %v1223_v17 = vadd.f32 %v1221_v16, %v1922_v25 }
 0xf0b   :  { %v1226_v12 = vsel %vm71_vm2, %v1223_v17, 0.0  ;;  %v1230_v21 = vmul.f32 %v1223_v17, %v1223_v17 }
 0xf0c   :  { %1227 = vadd.xlane.f32.xlu0 %v1226_v12 }
 0xf0d   :  { %v1231_v14 = vsel %vm71_vm2, %v1230_v21, 0.0 }
 0xf0e   :  { %1232 = vadd.xlane.f32.xlu2 %v1231_v14 }
 0xf20   :  { %1272 = vperm.xlu0 %1408, %v1269_v27  }
 0xf26   :  { %1263 = vperm.xlu2 %1407, %v1260_v18  }
 0xf7f   :  { %v1228_v22 = vpop.xlane.xlu0 %1227 }
 0xf80   :  { %v1229_v20 = vmul.f32 %v1228_v22, %v1604_v38 }
 0xf81   :  { %v1233_v19 = vpop.xlane.xlu2 %1232 }
 0xf82   :  { %v1235_v23 = vmul.f32 %v1229_v20, %v1229_v20  ;;  %v1234_v24 = vmul.f32 %v1233_v19, %v1604_v38  ;;  %v1237_v32 = vsub.f32 %v1223_v17, %v1229_v20  ;;  %v1224_v38 = vld [vmem:[%s2010_s1 + $0x1a7] sm:$0x1] }
 0xf84   :  { %v1236_v25 = vsub.f32 %v1234_v24, %v1235_v23 }
 0xf86   :  { %v1238_v26 = vadd.f32 1e-05, %v1236_v25 }
 0xf88   :  { %1480 = vrsqrt.f32 %v1238_v26  ;;  %vm1245_vm2 = vweird.f32 %v1238_v26 }
 0xf89   :  { %v1264_v42 = vpop.permute.xlu2 %1263 }
 0xf8e   :  { %v1481_v28 = vpop.eup %1480 }
 0xf8f   :  { %v1240_v48 = vmul.f32 %v1481_v28, %v1238_v26  ;;  %vm1246_vm0 = vweird.f32 %v1481_v28 }
 0xf90   :  { %vm1247_vm8 = vmor %vm1245_vm2, %vm1246_vm0 }
 0xf91   :  { %v1241_v9 = vmul.f32 %v1481_v28, %v1240_v48 }
 0xf92   :  { %v1273_v47 = vpop.permute.xlu0 %1272 }
 0xf93   :  { %v1242_v29 = vmul.f32 0.5, %v1241_v9 }
 0xf95   :  { %v1243_v30 = vsub.f32 1.5, %v1242_v29 }
 0xf97   :  { %v1244_v31 = vmul.f32 %v1481_v28, %v1243_v30 }
 0xf99   :  { %v1248_v33 = vsel %vm1247_vm8, %v1481_v28, %v1244_v31 }
 0xf9a   :  { %v1249_v34 = vmul.f32 %v1248_v33, %v1237_v32 }
 0xf9c   :  { %v1250_v36 = vmul.f32 %v1249_v34, %v1224_v38 }
 0xf9e   :  { %v1251_v39 = vadd.f32 %v1250_v36, %v1225_v35 }
 0xfa0   :  { %v1258_v41 = vperm.slane %v1251_v39, 0 }
 0xfa2   :  { %v1259_v43 = vmul.f32 %v1258_v41, %v1256_v40 }
 0xfa4   :  { %v1266_v44 = vadd.f32 %v1264_v42, %v1259_v43 }
 0xfa6   :  { %v1267_v45 = vmax.f32 %v1266_v44, 0.0 }
 0xfa8   :  { %1375 = vmatpush.msk.msra.mxu2 %vm1279_vm9, %v1267_v45 }
 0xfa9   :  { %1376 = vmatmul.msk.f32.vlgmr.msra.gmra.mxu2 %vm1275_vm15, %v1268_v46 }
0x102c   :  { %v1300_v49 = vpop.f32.mrf.mxu2 }
0x102d   :  { %v1301_v50 = vadd.f32 %v1300_v49, %v1273_v47 }
0x102f   :  { %v1303_v51 = vmax.f32 %v1301_v50, 0.0 }
0x1031   :  { %v1304_v55 = vsel %vm64_vm1, %v1303_v51, 0.0 }
0x1032   :  { %1305 = vst [vmem:[#allocation2] sm:$0xff] %v1304_v55 }
0x1033   :  { %1316 = dma.vmem_to_hbm [thread:$0]  %s1312_s3, 128, %s1314_s20, [#allocation3]  }
0x1034   :  { %1506 = dma.done.wait [#allocation3], 128  }
0x1035   :  { %1507 = vsyncadd [#allocation3], 4294967168 }
0x1036   :  { %1321 = vsyncpa [#allocation3], 1 }

</bundles_post_ra>
